<compile_context>
chip_gen: v7x
topology: tpu7x:2x2x1
jax: 0.10.0
libtpu: 0.0.40
codegen_flags: <defaults>
</compile_context>

<pallas_src>
import jax
import jax.numpy as jnp
from jax import lax
from jax.experimental import pallas as pl
from jax.experimental.pallas import tpu as pltpu


def conv_attn_kernel(x_ref, wqkv_ref, bqkv_ref, wp_ref, bp_ref, o_ref):
    bb, _, n = x_ref.shape
    hc = wp_ref.shape[1]

    # Small parameter tiles, loaded once per grid step (constant index_map ->
    # Pallas does not re-DMA them across steps).
    wqkv = wqkv_ref[...].astype(jnp.float32)     # (3*hc, C)
    bqkv = bqkv_ref[...].astype(jnp.float32)     # (3*hc, 1)
    wp = wp_ref[...].astype(jnp.float32)         # (C, hc)
    bp = bp_ref[...].astype(jnp.float32)         # (C, 1)
    ones_row = jnp.ones((1, n), jnp.float32)     # hoisted out of the loop

    # Contraction on the last dim of BOTH operands ("trans_b" form): the MXU
    # consumes the rhs without a materialized transpose.
    dn = (((1,), (1,)), ((), ()))

    for i in range(bb):                          # static unroll over packed batch
        x_t = x_ref[i].astype(jnp.float32)       # (C, N): channels on sublanes

        # Fused QKV 1x1 conv: single MXU push, lane-dense (3*hc, N) result.
        qkv = jnp.dot(wqkv, x_t, preferred_element_type=jnp.float32) + bqkv
        q_t = qkv[0:hc]                          # (hc, N)
        k_t = qkv[hc:2 * hc]                     # (hc, N)
        v_t = qkv[2 * hc:3 * hc]                 # (hc, N)

        # Attention scores (N, N): only q needs a tiny (hc, N)->(N, hc)
        # transpose; k is consumed directly with its contraction dim leading.
        q = q_t.T                                                     # (N, hc)
        s = jnp.dot(q, k_t, preferred_element_type=jnp.float32)       # (N, N)

        # Stabilized softmax numerator; normalization deferred past the value
        # matmul so the (N, N) matrix is never rescaled elementwise.
        p = jnp.exp(s - jnp.max(s, axis=-1, keepdims=True))           # (N, N)

        # z^T = v^T @ p^T and the softmax row-sums, produced directly in the
        # lane-dense (rows, N) orientation (only 8+1 MXU row pushes).
        z_t = lax.dot_general(v_t, p, dn,
                              preferred_element_type=jnp.float32)     # (hc, N)
        l_t = lax.dot_general(ones_row, p, dn,
                              preferred_element_type=jnp.float32)     # (1, N)

        # Deferred normalization on (hc, N) instead of (N, N).  Approx
        # reciprocal lands on the EUP slot; one Newton step (2 vregs of VPU
        # work) restores full f32 accuracy.
        inv = pl.reciprocal(l_t, approx=True)
        inv = inv * (2.0 - l_t * inv)
        z_t = z_t * inv

        # Output projection + residual, stored lane-dense in NCHW layout.
        # (Module default act=None, so no activation is applied.)
        out_t = x_t + jnp.dot(wp, z_t, preferred_element_type=jnp.float32) + bp
        o_ref[i] = out_t.astype(o_ref.dtype)


def _pick_block_b(b, max_block=4):
    """Largest divisor of b that is <= max_block (amortizes per-step overhead)."""
    for cand in range(min(b, max_block), 0, -1):
        if b % cand == 0:
            return cand
    return 1


def conv_attn(x_nchw, params, *, block_b=None):
    """x_nchw: (b, C, h, w) float32.  Returns (b, C, h, w)."""
    b, c, h, w = x_nchw.shape
    n = h * w
    hc = params["wp"].shape[1]
    if block_b is None:
        block_b = _pick_block_b(b)

    # NCHW -> (b, C, N): free reshape (no transpose); pixels land on lanes.
    x = x_nchw.reshape(b, c, n)

    out = pl.pallas_call(
        conv_attn_kernel,
        out_shape=jax.ShapeDtypeStruct((b, c, n), x.dtype),
        grid_spec=pltpu.PrefetchScalarGridSpec(
            num_scalar_prefetch=0,
            grid=(b // block_b,),
            in_specs=[
                pl.BlockSpec((block_b, c, n), lambda i: (i, 0, 0)),   # x (NCHW)
                pl.BlockSpec((3 * hc, c), lambda i: (0, 0)),          # fused Wqkv
                pl.BlockSpec((3 * hc, 1), lambda i: (0, 0)),          # fused bqkv
                pl.BlockSpec((c, hc), lambda i: (0, 0)),              # Wproj
                pl.BlockSpec((c, 1), lambda i: (0, 0)),               # bproj
            ],
            out_specs=pl.BlockSpec((block_b, c, n), lambda i: (i, 0, 0)),
        ),
        input_output_aliases={0: 0},   # out = x + delta, same shape/dtype
        compiler_params=pltpu.CompilerParams(
            dimension_semantics=("parallel",),
            vmem_limit_bytes=32 * 1024 * 1024),
    )(x, params["wqkv"], params["bqkv"], params["wp"], params["bp"])

    return out.reshape(b, c, h, w)


def conv_attn_reference(x_nchw, params):
    """Pure-JAX mirror of the PyTorch forward (for validation)."""
    b, c, h, w = x_nchw.shape
    n = h * w
    hc = params["wp"].shape[1]
    x = x_nchw.reshape(b, c, n)                                        # (b, C, N)
    qkv = jnp.einsum("oc,bcn->bon", params["wqkv"], x) + params["bqkv"][None]
    q, k, v = qkv[:, :hc], qkv[:, hc:2 * hc], qkv[:, 2 * hc:]          # (b, hc, N)
    s = jnp.einsum("bhn,bhm->bnm", q, k)                               # (b, N, N)
    p = jax.nn.softmax(s, axis=-1)
    z = jnp.einsum("bnm,bhm->bhn", p, v)                               # (b, hc, N)
    out = x + jnp.einsum("ch,bhn->bcn", params["wp"], z) + params["bp"][None]
    return out.reshape(b, c, h, w)


def init_params(key, in_channels, hidden_channels):
    """Synthetic Conv2d-1x1 parameters in the layouts the kernel consumes.

    wqkv: (3*hidden, in)   rows [Wq; Wk; Wv], each (hidden, in)
    bqkv: (3*hidden, 1)
    wp  : (in, hidden)
    bp  : (in, 1)
    """
    ks = jax.random.split(key, 8)
    s_in = 1.0 / jnp.sqrt(in_channels)
    s_hc = 1.0 / jnp.sqrt(hidden_channels)
    wq = jax.random.normal(ks[0], (hidden_channels, in_channels), jnp.float32) * s_in
    wk = jax.random.normal(ks[1], (hidden_channels, in_channels), jnp.float32) * s_in
    wv = jax.random.normal(ks[2], (hidden_channels, in_channels), jnp.float32) * s_in
    bq = jax.random.normal(ks[3], (hidden_channels, 1), jnp.float32) * s_in
    bk = jax.random.normal(ks[4], (hidden_channels, 1), jnp.float32) * s_in
    bv = jax.random.normal(ks[5], (hidden_channels, 1), jnp.float32) * s_in
    return {
        "wqkv": jnp.concatenate([wq, wk, wv], axis=0),
        "bqkv": jnp.concatenate([bq, bk, bv], axis=0),
        "wp": jax.random.normal(ks[6], (in_channels, hidden_channels), jnp.float32) * s_hc,
        "bp": jax.random.normal(ks[7], (in_channels, 1), jnp.float32) * s_hc,
    }


if __name__ == "__main__":
    # Module defaults: in_channels=16, hidden_channels=8, act=None.
    B, C, H, W = 2, 16, 16, 16
    HIDDEN = 8

    key = jax.random.PRNGKey(0)
    k_x, k_p = jax.random.split(key)
    x = jax.random.normal(k_x, (B, C, H, W), jnp.float32)
    params = init_params(k_p, C, HIDDEN)

    ref = jax.block_until_ready(conv_attn_reference(x, params))
    out = jax.block_until_ready(conv_attn(x, params))

    assert out.shape == (B, C, H, W)
    assert jnp.allclose(out, ref, atol=1e-4, rtol=1e-4), "mismatch vs reference"
    print("KERNEL_OK")
</pallas_src>

<mosaic_0001>
module attributes {stable_mosaic.version = 11 : i64} {
  func.func @conv_attn_kernel(%arg0: i32, %arg1: memref<2x16x256xf32, #tpu.memory_space<vmem>>, %arg2: memref<24x16xf32, #tpu.memory_space<vmem>>, %arg3: memref<24x1xf32, #tpu.memory_space<vmem>>, %arg4: memref<16x8xf32, #tpu.memory_space<vmem>>, %arg5: memref<16x1xf32, #tpu.memory_space<vmem>>, %arg6: memref<2x16x256xf32, #tpu.memory_space<vmem>>) attributes {dimension_semantics = [#tpu.dimension_semantics<parallel>], iteration_bounds = array<i64: 1>, scalar_prefetch = 0 : i64, scratch_operands = 0 : i64, tpu.core_type = #tpu.core_type<tc>, window_params = [{transform_indices = @transform_0, window_bounds = array<i64: 2, 16, 256>}, {pipeline_mode = #tpu.pipeline_mode<synchronous>, transform_indices = @transform_1, window_bounds = array<i64: 24, 16>}, {pipeline_mode = #tpu.pipeline_mode<synchronous>, transform_indices = @transform_2, window_bounds = array<i64: 24, 1>}, {pipeline_mode = #tpu.pipeline_mode<synchronous>, transform_indices = @transform_3, window_bounds = array<i64: 16, 8>}, {pipeline_mode = #tpu.pipeline_mode<synchronous>, transform_indices = @transform_4, window_bounds = array<i64: 16, 1>}, {transform_indices = @transform_5, window_bounds = array<i64: 2, 16, 256>}]} {
    %c0 = arith.constant 0 : index
    %c0_0 = arith.constant 0 : index
    %0 = vector.load %arg2[%c0, %c0_0] : memref<24x16xf32, #tpu.memory_space<vmem>>, vector<24x16xf32>
    %c0_1 = arith.constant 0 : index
    %c0_2 = arith.constant 0 : index
    %1 = vector.load %arg3[%c0_1, %c0_2] : memref<24x1xf32, #tpu.memory_space<vmem>>, vector<24x1xf32>
    %c0_3 = arith.constant 0 : index
    %c0_4 = arith.constant 0 : index
    %2 = vector.load %arg4[%c0_3, %c0_4] : memref<16x8xf32, #tpu.memory_space<vmem>>, vector<16x8xf32>
    %c0_5 = arith.constant 0 : index
    %c0_6 = arith.constant 0 : index
    %3 = vector.load %arg5[%c0_5, %c0_6] : memref<16x1xf32, #tpu.memory_space<vmem>>, vector<16x1xf32>
    %cst = arith.constant 1.000000e+00 : f32
    %4 = vector.broadcast %cst : f32 to vector<1x256xf32>
    %c0_7 = arith.constant 0 : index
    %c0_8 = arith.constant 0 : index
    %c0_9 = arith.constant 0 : index
    %5 = vector.load %arg1[%c0_7, %c0_8, %c0_9] : memref<2x16x256xf32, #tpu.memory_space<vmem>>, vector<1x16x256xf32>
    %6 = vector.shape_cast %5 : vector<1x16x256xf32> to vector<16x256xf32>
    %cst_10 = arith.constant dense<0.000000e+00> : vector<24x256xf32>
    %7 = tpu.matmul %0, %6, %cst_10 {dimension_numbers = #tpu.dot_dimension_numbers<[1], [0], [0], [1], [0, 0, 1, 1], [], []>} : vector<24x16xf32>, vector<16x256xf32>, vector<24x256xf32> -> vector<24x256xf32>
    %8 = vector.broadcast %1 : vector<24x1xf32> to vector<24x256xf32>
    %9 = arith.addf %7, %8 : vector<24x256xf32>
    %10 = vector.extract_strided_slice %9 {offsets = [0, 0], sizes = [8, 256], strides = [1, 1]} : vector<24x256xf32> to vector<8x256xf32>
    %11 = vector.extract_strided_slice %9 {offsets = [8, 0], sizes = [8, 256], strides = [1, 1]} : vector<24x256xf32> to vector<8x256xf32>
    %12 = vector.extract_strided_slice %9 {offsets = [16, 0], sizes = [8, 256], strides = [1, 1]} : vector<24x256xf32> to vector<8x256xf32>
    %13 = tpu.transpose %10, [1, 0] : vector<8x256xf32> -> vector<256x8xf32>
    %cst_11 = arith.constant dense<0.000000e+00> : vector<256x256xf32>
    %14 = tpu.matmul %13, %11, %cst_11 {dimension_numbers = #tpu.dot_dimension_numbers<[1], [0], [0], [1], [0, 0, 1, 1], [], []>} : vector<256x8xf32>, vector<8x256xf32>, vector<256x256xf32> -> vector<256x256xf32>
    %cst_12 = arith.constant dense<0xFF800000> : vector<256xf32>
    %15 = vector.multi_reduction <maximumf>, %14, %cst_12 [1] : vector<256x256xf32> to vector<256xf32>
    %16 = vector.shape_cast %15 : vector<256xf32> to vector<256x1xf32>
    %17 = vector.broadcast %16 : vector<256x1xf32> to vector<256x256xf32>
    %18 = arith.subf %14, %17 : vector<256x256xf32>
    %19 = math.exp %18 : vector<256x256xf32>
    %cst_13 = arith.constant dense<0.000000e+00> : vector<8x256xf32>
    %20 = tpu.matmul %12, %19, %cst_13 {dimension_numbers = #tpu.dot_dimension_numbers<[1], [1], [0], [0], [0, 0, 1, 0], [], []>} : vector<8x256xf32>, vector<256x256xf32>, vector<8x256xf32> -> vector<8x256xf32>
    %cst_14 = arith.constant dense<0.000000e+00> : vector<1x256xf32>
    %21 = tpu.matmul %4, %19, %cst_14 {dimension_numbers = #tpu.dot_dimension_numbers<[1], [1], [0], [0], [0, 0, 1, 0], [], []>} : vector<1x256xf32>, vector<256x256xf32>, vector<1x256xf32> -> vector<1x256xf32>
    %22 = tpu.reciprocal %21 {approx = true} : vector<1x256xf32> -> vector<1x256xf32>
    %23 = arith.mulf %21, %22 : vector<1x256xf32>
    %cst_15 = arith.constant 2.000000e+00 : f32
    %24 = vector.broadcast %cst_15 : f32 to vector<1x256xf32>
    %25 = arith.subf %24, %23 : vector<1x256xf32>
    %26 = arith.mulf %22, %25 : vector<1x256xf32>
    %27 = vector.broadcast %26 : vector<1x256xf32> to vector<8x256xf32>
    %28 = arith.mulf %20, %27 : vector<8x256xf32>
    %cst_16 = arith.constant dense<0.000000e+00> : vector<16x256xf32>
    %29 = tpu.matmul %2, %28, %cst_16 {dimension_numbers = #tpu.dot_dimension_numbers<[1], [0], [0], [1], [0, 0, 1, 1], [], []>} : vector<16x8xf32>, vector<8x256xf32>, vector<16x256xf32> -> vector<16x256xf32>
    %30 = arith.addf %6, %29 : vector<16x256xf32>
    %31 = vector.broadcast %3 : vector<16x1xf32> to vector<16x256xf32>
    %32 = arith.addf %30, %31 : vector<16x256xf32>
    %c0_17 = arith.constant 0 : index
    %c0_18 = arith.constant 0 : index
    %c0_19 = arith.constant 0 : index
    %33 = vector.load %arg6[%c0_17, %c0_18, %c0_19] : memref<2x16x256xf32, #tpu.memory_space<vmem>>, vector<1x16x256xf32>
    %34 = vector.shape_cast %33 : vector<1x16x256xf32> to vector<16x256xf32>
    %35 = vector.shape_cast %32 : vector<16x256xf32> to vector<1x16x256xf32>
    tpu.vector_store %arg6[%c0_17, %c0_18, %c0_19], %35 {strides = array<i32>} : memref<2x16x256xf32, #tpu.memory_space<vmem>>, vector<1x16x256xf32>,
    %c1 = arith.constant 1 : index
    %c0_20 = arith.constant 0 : index
    %c0_21 = arith.constant 0 : index
    %36 = vector.load %arg1[%c1, %c0_20, %c0_21] : memref<2x16x256xf32, #tpu.memory_space<vmem>>, vector<1x16x256xf32>
    %37 = vector.shape_cast %36 : vector<1x16x256xf32> to vector<16x256xf32>
    %cst_22 = arith.constant dense<0.000000e+00> : vector<24x256xf32>
    %38 = tpu.matmul %0, %37, %cst_22 {dimension_numbers = #tpu.dot_dimension_numbers<[1], [0], [0], [1], [0, 0, 1, 1], [], []>} : vector<24x16xf32>, vector<16x256xf32>, vector<24x256xf32> -> vector<24x256xf32>
    %39 = vector.broadcast %1 : vector<24x1xf32> to vector<24x256xf32>
    %40 = arith.addf %38, %39 : vector<24x256xf32>
    %41 = vector.extract_strided_slice %40 {offsets = [0, 0], sizes = [8, 256], strides = [1, 1]} : vector<24x256xf32> to vector<8x256xf32>
    %42 = vector.extract_strided_slice %40 {offsets = [8, 0], sizes = [8, 256], strides = [1, 1]} : vector<24x256xf32> to vector<8x256xf32>
    %43 = vector.extract_strided_slice %40 {offsets = [16, 0], sizes = [8, 256], strides = [1, 1]} : vector<24x256xf32> to vector<8x256xf32>
    %44 = tpu.transpose %41, [1, 0] : vector<8x256xf32> -> vector<256x8xf32>
    %cst_23 = arith.constant dense<0.000000e+00> : vector<256x256xf32>
    %45 = tpu.matmul %44, %42, %cst_23 {dimension_numbers = #tpu.dot_dimension_numbers<[1], [0], [0], [1], [0, 0, 1, 1], [], []>} : vector<256x8xf32>, vector<8x256xf32>, vector<256x256xf32> -> vector<256x256xf32>
    %cst_24 = arith.constant dense<0xFF800000> : vector<256xf32>
    %46 = vector.multi_reduction <maximumf>, %45, %cst_24 [1] : vector<256x256xf32> to vector<256xf32>
    %47 = vector.shape_cast %46 : vector<256xf32> to vector<256x1xf32>
    %48 = vector.broadcast %47 : vector<256x1xf32> to vector<256x256xf32>
    %49 = arith.subf %45, %48 : vector<256x256xf32>
    %50 = math.exp %49 : vector<256x256xf32>
    %cst_25 = arith.constant dense<0.000000e+00> : vector<8x256xf32>
    %51 = tpu.matmul %43, %50, %cst_25 {dimension_numbers = #tpu.dot_dimension_numbers<[1], [1], [0], [0], [0, 0, 1, 0], [], []>} : vector<8x256xf32>, vector<256x256xf32>, vector<8x256xf32> -> vector<8x256xf32>
    %cst_26 = arith.constant dense<0.000000e+00> : vector<1x256xf32>
    %52 = tpu.matmul %4, %50, %cst_26 {dimension_numbers = #tpu.dot_dimension_numbers<[1], [1], [0], [0], [0, 0, 1, 0], [], []>} : vector<1x256xf32>, vector<256x256xf32>, vector<1x256xf32> -> vector<1x256xf32>
    %53 = tpu.reciprocal %52 {approx = true} : vector<1x256xf32> -> vector<1x256xf32>
    %54 = arith.mulf %52, %53 : vector<1x256xf32>
    %cst_27 = arith.constant 2.000000e+00 : f32
    %55 = vector.broadcast %cst_27 : f32 to vector<1x256xf32>
    %56 = arith.subf %55, %54 : vector<1x256xf32>
    %57 = arith.mulf %53, %56 : vector<1x256xf32>
    %58 = vector.broadcast %57 : vector<1x256xf32> to vector<8x256xf32>
    %59 = arith.mulf %51, %58 : vector<8x256xf32>
    %cst_28 = arith.constant dense<0.000000e+00> : vector<16x256xf32>
    %60 = tpu.matmul %2, %59, %cst_28 {dimension_numbers = #tpu.dot_dimension_numbers<[1], [0], [0], [1], [0, 0, 1, 1], [], []>} : vector<16x8xf32>, vector<8x256xf32>, vector<16x256xf32> -> vector<16x256xf32>
    %61 = arith.addf %37, %60 : vector<16x256xf32>
    %62 = vector.broadcast %3 : vector<16x1xf32> to vector<16x256xf32>
    %63 = arith.addf %61, %62 : vector<16x256xf32>
    %c1_29 = arith.constant 1 : index
    %c0_30 = arith.constant 0 : index
    %c0_31 = arith.constant 0 : index
    %64 = vector.load %arg6[%c1_29, %c0_30, %c0_31] : memref<2x16x256xf32, #tpu.memory_space<vmem>>, vector<1x16x256xf32>
    %65 = vector.shape_cast %64 : vector<1x16x256xf32> to vector<16x256xf32>
    %66 = vector.shape_cast %63 : vector<16x256xf32> to vector<1x16x256xf32>
    tpu.vector_store %arg6[%c1_29, %c0_30, %c0_31], %66 {strides = array<i32>} : memref<2x16x256xf32, #tpu.memory_space<vmem>>, vector<1x16x256xf32>,
    return
  }
  func.func @transform_0(%arg0: i32) -> (i32, i32, i32) {
    %c0_i32 = arith.constant 0 : i32
    %c0_i32_0 = arith.constant 0 : i32
    %c0_i32_1 = arith.constant 0 : i32
    return %arg0, %c0_i32, %c0_i32_0 : i32, i32, i32
  }
  func.func @transform_1(%arg0: i32) -> (i32, i32) {
    %c0_i32 = arith.constant 0 : i32
    %c0_i32_0 = arith.constant 0 : i32
    %c0_i32_1 = arith.constant 0 : i32
    return %c0_i32, %c0_i32_0 : i32, i32
  }
  func.func @transform_2(%arg0: i32) -> (i32, i32) {
    %c0_i32 = arith.constant 0 : i32
    %c0_i32_0 = arith.constant 0 : i32
    %c0_i32_1 = arith.constant 0 : i32
    return %c0_i32, %c0_i32_0 : i32, i32
  }
  func.func @transform_3(%arg0: i32) -> (i32, i32) {
    %c0_i32 = arith.constant 0 : i32
    %c0_i32_0 = arith.constant 0 : i32
    %c0_i32_1 = arith.constant 0 : i32
    return %c0_i32, %c0_i32_0 : i32, i32
  }
  func.func @transform_4(%arg0: i32) -> (i32, i32) {
    %c0_i32 = arith.constant 0 : i32
    %c0_i32_0 = arith.constant 0 : i32
    %c0_i32_1 = arith.constant 0 : i32
    return %c0_i32, %c0_i32_0 : i32, i32
  }
  func.func @transform_5(%arg0: i32) -> (i32, i32, i32) {
    %c0_i32 = arith.constant 0 : i32
    %c0_i32_0 = arith.constant 0 : i32
    %c0_i32_1 = arith.constant 0 : i32
    return %arg0, %c0_i32, %c0_i32_0 : i32, i32, i32
  }
}

</mosaic_0001>

<bundles_post_ra>
// kernel: tpu_custom_call.1
= control target key start
LH: loop header
LB: loop body
LE: loop exit
PB: predicated region body
PF: predicated region fallthrough
CT: control target
= control target key end

     0   :  { %10 = vsyncpa [#allocation3], 0  ;;  %s3695_s0 = inlined_call_operand.hbm [shape: f32[2,16,256], index: 0, kind: input, shape index: {}, may-alias: {0,5}]   ;;  %s3696_s1 = inlined_call_operand.vmem [shape: f32[24,16], index: 1, kind: input, shape index: {}]   ;;  %s3697_s2 = inlined_call_operand.vmem [shape: f32[24,1], index: 2, kind: input, shape index: {}]   ;;  %s3698_s3 = inlined_call_operand.vmem [shape: f32[16,8], index: 3, kind: input, shape index: {}]   ;;  %s3699_s4 = inlined_call_operand.vmem [shape: f32[16,1], index: 4, kind: input, shape index: {}]   ;;  %s3700_s5 = inlined_call_operand.hbm [shape: f32[2,16,256], index: 5, kind: output, shape index: {}, may-alias: {0,5}]  }
   0x1   :  { %11 = vsyncpa [#allocation4], 0  ;;  %s2860_s18 = smov [#allocation2]   ;;  %s2812_s22 = scalar_lea.hbm %s3695_s0, 1024 }
   0x2   :  { %s17_s19 = sshll.u32 %s2860_s18, 4  ;;  %p2813_p0 = scmp.ne.s32.totalorder %s3695_s0, %s2812_s22  ;;  %s18_s19 = int_to_ptr.vmem [resolvable:$true] %s17_s19 }
   0x3   :  { %p2816_p1 = scmp.lt.u32.totalorder %s2812_s22, %s3695_s0 }
   0x5   :  { %p2818_p2 = pnand %p2816_p1, %p2813_p0 }
   0x7   :  { %2821 = shalt.err (!%p2818_p2)
}
   0x8   :  { %s2822_s27 = scalar_lea.vmem %s18_s19, 1024  ;;  %p2827_p4 = scmp.lt.s32.totalorder %s18_s19, %s18_s19 }
   0x9   :  { %p2823_p3 = scmp.ne.s32.totalorder %s18_s19, %s2822_s27  ;;  %p2828_p5 = scmp.lt.s32.totalorder %s2822_s27, %s2822_s27 }
   0xb   :  { %p2829_p6 = por %p2828_p5, %p2827_p4 }
   0xd   :  { %p2830_p7 = pnand %p2829_p6, %p2823_p3 }
   0xf   :  { %2833 = shalt.err (!%p2830_p7)
}
  0x10   :  { %s2861_s28 = smov 256   ;;  %s2862_s29 = smov 16  }
  0x11   :  { %23 = dma.hbm_to_vmem [thread:$0]  %s3695_s0, 1024, %s18_s19, [#allocation3], %s2861_s28, %s2861_s28, %s2862_s29  }
  0x12   :  { %2856 = dma.done.wait [#allocation3], 1024  }
  0x13   :  { %2857 = vsyncadd [#allocation3], 4294966272  ;;  %v3702_v0 = vmov 0.0   ;;  %v3701_v1 = vmov 0   ;;  %v46_v2 = vld [vmem:[#allocation2 + $0x8] sm:$0xff]  ;;  %v48_v3 = vld [vmem:[#allocation2 + $0x18] sm:$0xff] }
  0x14   :  { %138 = vmatprep.mubr.f32.mxu0 %v3702_v0  ;;  %2533 = vset.pattern.permute.xlu0 %v3701_v1  ;;  %v45_v4 = vld [vmem:[#allocation2] sm:$0xff]  ;;  %v2262_v5 = vpack.c.bf16 %v48_v3, %v46_v2  ;;  %v47_v6 = vld [vmem:[#allocation2 + $0x10] sm:$0xff]  ;;  %vm64_vm0 = vcmask 130048   ;;  %v39_v10 = vld [vmem:[%s3697_s2 + $0x8] sm:$0xff]  ;;  %vm221_vm1 = vcmask 64512   ;;  %s2866_s9 = smov [#allocation5]  }
  0x15   :  { %382 = vmatprep.mubr.f32.mxu1 %v3702_v0  ;;  %v2264_v7 = vpack.c.bf16 %v47_v6, %v45_v4  ;;  %v38_v8 = vld [vmem:[%s3697_s2] sm:$0xff]  ;;  %v36_v11 = vld [vmem:[%s3696_s1 + $0x8] sm:$0xff]  ;;  %v37_v54 = vld [vmem:[%s3696_s1 + $0x10] sm:$0xff]  ;;  %s2176_s10 = sshll.u32 %s2866_s9, 4  ;;  %s2177_s10 = int_to_ptr.vmem [resolvable:$true] %s2176_s10 }
  0x16   :  { %2263 = vmatprep.subr.bf16.mxu0 %v2262_v5  ;;  %51 = vperm.xlu0 %2533, %v38_v8   ;;  %v35_v9 = vld [vmem:[%s3696_s1] sm:$0xff]  ;;  %p2839_p9 = scmp.lt.s32.totalorder %s2177_s10, %s2177_s10 }
  0x17   :  { %2265 = vmatpush1.bf16.msra.mxu0 %v2264_v7 }
  0x1a   :  { %2188 = vmatmul.mubr.msk.f32.vlgmr.msra.gmra.mrb[0].mxu0 %vm64_vm0, %v35_v9  ;;  %56 = vperm.xlu0 %2533, %v39_v10  }
  0x1b   :  { %144 = vmatprep.mubr.f32.mxu0 %v3702_v0 }
  0x1e   :  { %2189 = vmatmul.mubr.msk.f32.gmra.mrb[2].mxu0 %vm64_vm0, %v36_v11 }
  0x1f   :  { %150 = vmatprep.mubr.f32.mxu0 %v3702_v0 }
  0x22   :  { %2190 = vmatmul.mubr.msk.f32.gmra.mrb[4].mxu0 %vm64_vm0, %v37_v54 }
  0x95   :  { %v2931_v12 = vpop.permute.xlu0 %51 }
  0x96   :  { %3739 = vst [vmem:[#allocation8_spill] sm:$0xff] %v2931_v12 }
  0x99   :  { %v2934_v17 = vpop.permute.xlu0 %56 }
  0x9a   :  { %3740 = vst [vmem:[#allocation9_spill] sm:$0xff] %v2934_v17 }
  0xed   :  { %v140_v13 = vpop.f32.mrb[0].mxu0 }
  0xee   :  { %v142_v14 = vpop.f32.mrb[1].mxu0  ;;  %v141_v15 = vadd.f32 %v140_v13, %v2931_v12 }
  0xef   :  { %v143_v21 = vadd.f32 %v142_v14, %v2931_v12 }
  0xf0   :  { %157 = vxpose.xlu1.b32.start.end [1/1] (short) %v141_v15, 128 }
  0xf1   :  { %v146_v16 = vpop.f32.mrb[2].mxu0 }
  0xf2   :  { %v148_v18 = vpop.f32.mrb[3].mxu0  ;;  %v147_v20 = vadd.f32 %v146_v16, %v2934_v17 }
  0xf3   :  { %v149_v19 = vadd.f32 %v148_v18, %v2934_v17 }
  0xf5   :  { %318 = vmatprep.subr.mxu1 %v149_v19 }
  0xf6   :  { %319 = vmatpush1.msra.mxu1 %v147_v20 }
 0x12d   :  { %189 = vxpose.xlu1.b32.start.end [1/1] (short) %v143_v21, 128 }
 0x170   :  { %v173_v22 = vpop.trf.xlu1 }
 0x171   :  { %2191 = vmatmul.mubr.msk.f32.vlgmr.msra.gmra.mrb[0].mxu1 %vm221_vm1, %v173_v22 }
 0x172   :  { %388 = vmatprep.mubr.f32.mxu1 %v3702_v0 }
 0x174   :  { %v174_v23 = vpop.trf.xlu1 }
 0x175   :  { %2192 = vmatmul.mubr.msk.f32.gmra.mrb[2].mxu1 %vm221_vm1, %v174_v23 }
 0x176   :  { %394 = vmatprep.mubr.f32.mxu1 %v3702_v0 }
 0x178   :  { %v175_v24 = vpop.trf.xlu1 }
 0x179   :  { %2193 = vmatmul.mubr.msk.f32.gmra.mrb[4].mxu1 %vm221_vm1, %v175_v24 }
 0x17a   :  { %400 = vmatprep.mubr.f32.mxu1 %v3702_v0 }
 0x17c   :  { %v176_v25 = vpop.trf.xlu1 }
 0x17d   :  { %2194 = vmatmul.mubr.msk.f32.gmra.mrb[6].mxu1 %vm221_vm1, %v176_v25 }
 0x17e   :  { %406 = vmatprep.mubr.f32.mxu1 %v3702_v0 }
 0x180   :  { %v177_v26 = vpop.trf.xlu1 }
 0x181   :  { %2195 = vmatmul.mubr.msk.f32.gmra.mrb[8].mxu1 %vm221_vm1, %v177_v26 }
 0x182   :  { %412 = vmatprep.mubr.f32.mxu1 %v3702_v0 }
 0x184   :  { %v178_v27 = vpop.trf.xlu1 }
 0x185   :  { %2196 = vmatmul.mubr.msk.f32.gmra.mrb[10].mxu1 %vm221_vm1, %v178_v27 }
 0x186   :  { %418 = vmatprep.mubr.f32.mxu1 %v3702_v0 }
 0x188   :  { %v179_v28 = vpop.trf.xlu1 }
 0x189   :  { %2197 = vmatmul.mubr.msk.f32.gmra.mrb[12].mxu1 %vm221_vm1, %v179_v28 }
 0x18a   :  { %424 = vmatprep.mubr.f32.mxu1 %v3702_v0 }
 0x18c   :  { %v180_v29 = vpop.trf.xlu1 }
 0x18d   :  { %2198 = vmatmul.mubr.msk.f32.gmra.mrb[14].mxu1 %vm221_vm1, %v180_v29 }
 0x18e   :  { %430 = vmatprep.mubr.f32.mxu1 %v3702_v0 }
 0x190   :  { %v181_v30 = vpop.trf.xlu1 }
 0x191   :  { %2199 = vmatmul.mubr.msk.f32.gmra.mrb[16].mxu1 %vm221_vm1, %v181_v30 }
 0x192   :  { %436 = vmatprep.mubr.f32.mxu1 %v3702_v0 }
 0x194   :  { %v182_v31 = vpop.trf.xlu1 }
 0x195   :  { %2200 = vmatmul.mubr.msk.f32.gmra.mrb[18].mxu1 %vm221_vm1, %v182_v31 }
 0x196   :  { %442 = vmatprep.mubr.f32.mxu1 %v3702_v0 }
 0x198   :  { %v183_v32 = vpop.trf.xlu1 }
 0x199   :  { %2201 = vmatmul.mubr.msk.f32.gmra.mrb[20].mxu1 %vm221_vm1, %v183_v32 }
 0x19a   :  { %448 = vmatprep.mubr.f32.mxu1 %v3702_v0 }
 0x19c   :  { %v184_v33 = vpop.trf.xlu1 }
 0x19d   :  { %2202 = vmatmul.mubr.msk.f32.gmra.mrb[22].mxu1 %vm221_vm1, %v184_v33 }
 0x19e   :  { %454 = vmatprep.mubr.f32.mxu1 %v3702_v0 }
 0x1a0   :  { %v185_v34 = vpop.trf.xlu1 }
 0x1a1   :  { %2203 = vmatmul.mubr.msk.f32.gmra.mrb[24].mxu1 %vm221_vm1, %v185_v34 }
 0x1a2   :  { %460 = vmatprep.mubr.f32.mxu1 %v3702_v0 }
 0x1a4   :  { %v186_v35 = vpop.trf.xlu1 }
 0x1a5   :  { %2204 = vmatmul.mubr.msk.f32.gmra.mrb[26].mxu1 %vm221_vm1, %v186_v35 }
 0x1a6   :  { %466 = vmatprep.mubr.f32.mxu1 %v3702_v0 }
 0x1a8   :  { %v187_v36 = vpop.trf.xlu1 }
 0x1a9   :  { %2205 = vmatmul.mubr.msk.f32.gmra.mrb[28].mxu1 %vm221_vm1, %v187_v36 }
 0x1aa   :  { %472 = vmatprep.mubr.f32.mxu1 %v3702_v0 }
 0x1ac   :  { %v188_v37 = vpop.trf.xlu1 }
 0x1ad   :  { %2206 = vmatmul.mubr.msk.f32.gmra.mrb[30].mxu1 %vm221_vm1, %v188_v37 }
 0x1ae   :  { %478 = vmatprep.mubr.f32.mxu1 %v3702_v0 }
 0x1b0   :  { %v205_v38 = vpop.trf.xlu1 }
 0x1b1   :  { %2207 = vmatmul.mubr.msk.f32.gmra.mrb[32].mxu1 %vm221_vm1, %v205_v38 }
 0x1b2   :  { %484 = vmatprep.mubr.f32.mxu1 %v3702_v0 }
 0x1b4   :  { %v206_v39 = vpop.trf.xlu1 }
 0x1b5   :  { %2208 = vmatmul.mubr.msk.f32.gmra.mrb[34].mxu1 %vm221_vm1, %v206_v39 }
 0x1b6   :  { %490 = vmatprep.mubr.f32.mxu1 %v3702_v0 }
 0x1b8   :  { %v207_v40 = vpop.trf.xlu1 }
 0x1b9   :  { %2209 = vmatmul.mubr.msk.f32.gmra.mrb[36].mxu1 %vm221_vm1, %v207_v40 }
 0x1ba   :  { %496 = vmatprep.mubr.f32.mxu1 %v3702_v0 }
 0x1bc   :  { %v208_v41 = vpop.trf.xlu1 }
 0x1bd   :  { %2210 = vmatmul.mubr.msk.f32.gmra.mrb[38].mxu1 %vm221_vm1, %v208_v41 }
 0x1be   :  { %502 = vmatprep.mubr.f32.mxu1 %v3702_v0 }
 0x1c0   :  { %v209_v42 = vpop.trf.xlu1 }
 0x1c1   :  { %2211 = vmatmul.mubr.msk.f32.gmra.mrb[40].mxu1 %vm221_vm1, %v209_v42 }
 0x1c2   :  { %508 = vmatprep.mubr.f32.mxu1 %v3702_v0 }
 0x1c4   :  { %v210_v43 = vpop.trf.xlu1 }
 0x1c5   :  { %2212 = vmatmul.mubr.msk.f32.gmra.mrb[42].mxu1 %vm221_vm1, %v210_v43 }
 0x1c6   :  { %514 = vmatprep.mubr.f32.mxu1 %v3702_v0 }
 0x1c8   :  { %v211_v44 = vpop.trf.xlu1 }
 0x1c9   :  { %2213 = vmatmul.mubr.msk.f32.gmra.mrb[44].mxu1 %vm221_vm1, %v211_v44 }
 0x1ca   :  { %520 = vmatprep.mubr.f32.mxu1 %v3702_v0 }
 0x1cc   :  { %v212_v45 = vpop.trf.xlu1 }
 0x1cd   :  { %2214 = vmatmul.mubr.msk.f32.gmra.mrb[46].mxu1 %vm221_vm1, %v212_v45 }
 0x1ce   :  { %526 = vmatprep.mubr.f32.mxu1 %v3702_v0 }
 0x1d0   :  { %v213_v46 = vpop.trf.xlu1 }
 0x1d1   :  { %2215 = vmatmul.mubr.msk.f32.gmra.mrb[48].mxu1 %vm221_vm1, %v213_v46 }
 0x1d2   :  { %532 = vmatprep.mubr.f32.mxu1 %v3702_v0 }
 0x1d4   :  { %v214_v47 = vpop.trf.xlu1 }
 0x1d5   :  { %2216 = vmatmul.mubr.msk.f32.gmra.mrb[50].mxu1 %vm221_vm1, %v214_v47 }
 0x1d6   :  { %538 = vmatprep.mubr.f32.mxu1 %v3702_v0 }
 0x1d8   :  { %v215_v48 = vpop.trf.xlu1 }
 0x1d9   :  { %2217 = vmatmul.mubr.msk.f32.gmra.mrb[52].mxu1 %vm221_vm1, %v215_v48 }
 0x1da   :  { %544 = vmatprep.mubr.f32.mxu1 %v3702_v0 }
 0x1dc   :  { %v216_v49 = vpop.trf.xlu1 }
 0x1dd   :  { %2218 = vmatmul.mubr.msk.f32.gmra.mrb[54].mxu1 %vm221_vm1, %v216_v49 }
 0x1de   :  { %550 = vmatprep.mubr.f32.mxu1 %v3702_v0 }
 0x1e0   :  { %v217_v50 = vpop.trf.xlu1 }
 0x1e1   :  { %2219 = vmatmul.mubr.msk.f32.gmra.mrb[56].mxu1 %vm221_vm1, %v217_v50 }
 0x1e2   :  { %556 = vmatprep.mubr.f32.mxu1 %v3702_v0 }
 0x1e4   :  { %v218_v51 = vpop.trf.xlu1 }
 0x1e5   :  { %2220 = vmatmul.mubr.msk.f32.gmra.mrb[58].mxu1 %vm221_vm1, %v218_v51 }
 0x1e6   :  { %562 = vmatprep.mubr.f32.mxu1 %v3702_v0 }
 0x1e8   :  { %v219_v52 = vpop.trf.xlu1 }
 0x1e9   :  { %2221 = vmatmul.mubr.msk.f32.gmra.mrb[60].mxu1 %vm221_vm1, %v219_v52 }
 0x1ea   :  { %568 = vmatprep.mubr.f32.mxu1 %v3702_v0 }
 0x1ec   :  { %v220_v53 = vpop.trf.xlu1 }
 0x1ed   :  { %2222 = vmatmul.mubr.msk.f32.gmra.mrb[62].mxu1 %vm221_vm1, %v220_v53 }
 0x244   :  { %v3006_v55 = vpop.f32.mrb[0].mxu1 }
 0x245   :  { %v3008_v56 = vpop.f32.mrb[1].mxu1 }
 0x246   :  { %v575_v57 = vmax.f32 %v3006_v55, %v3008_v56 }
 0x248   :  { %576 = vmax.xlane.f32.xlu0 %v575_v57  ;;  %v3012_v58 = vpop.f32.mrb[2].mxu1 }
 0x249   :  { %v3014_v59 = vpop.f32.mrb[3].mxu1 }
 0x24a   :  { %v578_v60 = vmax.f32 %v3012_v58, %v3014_v59 }
 0x24c   :  { %579 = vmax.xlane.f32.xlu0 %v578_v60  ;;  %v3018_v61 = vpop.f32.mrb[4].mxu1 }
 0x24d   :  { %v3020_v62 = vpop.f32.mrb[5].mxu1 }
 0x24e   :  { %v581_v63 = vmax.f32 %v3018_v61, %v3020_v62 }
 0x250   :  { %582 = vmax.xlane.f32.xlu0 %v581_v63  ;;  %v3024_v2 = vpop.f32.mrb[6].mxu1 }
 0x251   :  { %v3026_v3 = vpop.f32.mrb[7].mxu1 }
 0x252   :  { %v584_v4 = vmax.f32 %v3024_v2, %v3026_v3 }
 0x254   :  { %585 = vmax.xlane.f32.xlu0 %v584_v4  ;;  %v3030_v5 = vpop.f32.mrb[8].mxu1 }
 0x255   :  { %v3032_v6 = vpop.f32.mrb[9].mxu1 }
 0x256   :  { %v587_v7 = vmax.f32 %v3030_v5, %v3032_v6 }
 0x258   :  { %588 = vmax.xlane.f32.xlu0 %v587_v7  ;;  %v3036_v8 = vpop.f32.mrb[10].mxu1 }
 0x259   :  { %v3038_v9 = vpop.f32.mrb[11].mxu1 }
 0x25a   :  { %v590_v10 = vmax.f32 %v3036_v8, %v3038_v9 }
 0x25c   :  { %591 = vmax.xlane.f32.xlu0 %v590_v10  ;;  %v3042_v11 = vpop.f32.mrb[12].mxu1 }
 0x25d   :  { %v3044_v13 = vpop.f32.mrb[13].mxu1 }
 0x25e   :  { %v593_v14 = vmax.f32 %v3042_v11, %v3044_v13 }
 0x260   :  { %594 = vmax.xlane.f32.xlu0 %v593_v14  ;;  %v3048_v15 = vpop.f32.mrb[14].mxu1 }
 0x261   :  { %v3050_v16 = vpop.f32.mrb[15].mxu1 }
 0x262   :  { %v596_v18 = vmax.f32 %v3048_v15, %v3050_v16 }
 0x264   :  { %597 = vmax.xlane.f32.xlu0 %v596_v18  ;;  %v3054_v19 = vpop.f32.mrb[16].mxu1 }
 0x265   :  { %v3056_v20 = vpop.f32.mrb[17].mxu1 }
 0x266   :  { %v599_v21 = vmax.f32 %v3054_v19, %v3056_v20 }
 0x268   :  { %600 = vmax.xlane.f32.xlu1 %v599_v21  ;;  %v3060_v22 = vpop.f32.mrb[18].mxu1 }
 0x269   :  { %v3062_v23 = vpop.f32.mrb[19].mxu1 }
 0x26a   :  { %v602_v24 = vmax.f32 %v3060_v22, %v3062_v23 }
 0x26c   :  { %603 = vmax.xlane.f32.xlu0 %v602_v24  ;;  %v3066_v25 = vpop.f32.mrb[20].mxu1 }
 0x26d   :  { %v3068_v26 = vpop.f32.mrb[21].mxu1 }
 0x26e   :  { %v605_v27 = vmax.f32 %v3066_v25, %v3068_v26 }
 0x270   :  { %606 = vmax.xlane.f32.xlu0 %v605_v27  ;;  %v3072_v28 = vpop.f32.mrb[22].mxu1 }
 0x271   :  { %v3074_v29 = vpop.f32.mrb[23].mxu1 }
 0x272   :  { %v608_v30 = vmax.f32 %v3072_v28, %v3074_v29 }
 0x274   :  { %609 = vmax.xlane.f32.xlu0 %v608_v30  ;;  %v3078_v31 = vpop.f32.mrb[24].mxu1 }
 0x275   :  { %v3080_v32 = vpop.f32.mrb[25].mxu1 }
 0x276   :  { %v611_v33 = vmax.f32 %v3078_v31, %v3080_v32 }
 0x278   :  { %612 = vmax.xlane.f32.xlu0 %v611_v33  ;;  %v3084_v34 = vpop.f32.mrb[26].mxu1 }
 0x279   :  { %v3086_v35 = vpop.f32.mrb[27].mxu1 }
 0x27a   :  { %v614_v36 = vmax.f32 %v3084_v34, %v3086_v35 }
 0x27c   :  { %615 = vmax.xlane.f32.xlu0 %v614_v36  ;;  %v3090_v37 = vpop.f32.mrb[28].mxu1 }
 0x27d   :  { %v3092_v38 = vpop.f32.mrb[29].mxu1 }
 0x27e   :  { %v617_v39 = vmax.f32 %v3090_v37, %v3092_v38 }
 0x280   :  { %618 = vmax.xlane.f32.xlu0 %v617_v39  ;;  %v3096_v40 = vpop.f32.mrb[30].mxu1 }
 0x281   :  { %v3098_v41 = vpop.f32.mrb[31].mxu1 }
 0x282   :  { %v620_v42 = vmax.f32 %v3096_v40, %v3098_v41 }
 0x284   :  { %621 = vmax.xlane.f32.xlu0 %v620_v42  ;;  %v3102_v43 = vpop.f32.mrb[32].mxu1 }
 0x285   :  { %v3104_v44 = vpop.f32.mrb[33].mxu1 }
 0x286   :  { %v623_v45 = vmax.f32 %v3102_v43, %v3104_v44 }
 0x288   :  { %624 = vmax.xlane.f32.xlu0 %v623_v45  ;;  %v3108_v46 = vpop.f32.mrb[34].mxu1 }
 0x289   :  { %v3110_v47 = vpop.f32.mrb[35].mxu1 }
 0x28a   :  { %v626_v48 = vmax.f32 %v3108_v46, %v3110_v47 }
 0x28c   :  { %627 = vmax.xlane.f32.xlu0 %v626_v48  ;;  %v3114_v49 = vpop.f32.mrb[36].mxu1 }
 0x28d   :  { %v3116_v50 = vpop.f32.mrb[37].mxu1 }
 0x28e   :  { %v629_v51 = vmax.f32 %v3114_v49, %v3116_v50 }
 0x290   :  { %630 = vmax.xlane.f32.xlu0 %v629_v51  ;;  %v3120_v52 = vpop.f32.mrb[38].mxu1 }
 0x291   :  { %v3122_v53 = vpop.f32.mrb[39].mxu1 }
 0x292   :  { %v632_v54 = vmax.f32 %v3120_v52, %v3122_v53 }
 0x294   :  { %633 = vmax.xlane.f32.xlu0 %v632_v54  ;;  %v3126_v57 = vpop.f32.mrb[40].mxu1 }
 0x295   :  { %v3128_v60 = vpop.f32.mrb[41].mxu1 }
 0x296   :  { %v635_v63 = vmax.f32 %v3126_v57, %v3128_v60 }
 0x298   :  { %636 = vmax.xlane.f32.xlu0 %v635_v63  ;;  %v3132_v4 = vpop.f32.mrb[42].mxu1 }
 0x299   :  { %v3134_v7 = vpop.f32.mrb[43].mxu1 }
 0x29a   :  { %v638_v10 = vmax.f32 %v3132_v4, %v3134_v7 }
 0x29c   :  { %639 = vmax.xlane.f32.xlu0 %v638_v10  ;;  %v3138_v14 = vpop.f32.mrb[44].mxu1 }
 0x29d   :  { %v3140_v18 = vpop.f32.mrb[45].mxu1 }
 0x29e   :  { %v641_v21 = vmax.f32 %v3138_v14, %v3140_v18 }
 0x2a0   :  { %642 = vmax.xlane.f32.xlu0 %v641_v21  ;;  %v3144_v24 = vpop.f32.mrb[46].mxu1 }
 0x2a1   :  { %v3146_v27 = vpop.f32.mrb[47].mxu1 }
 0x2a2   :  { %v644_v30 = vmax.f32 %v3144_v24, %v3146_v27 }
 0x2a4   :  { %645 = vmax.xlane.f32.xlu0 %v644_v30  ;;  %v3150_v33 = vpop.f32.mrb[48].mxu1 }
 0x2a5   :  { %v3152_v36 = vpop.f32.mrb[49].mxu1 }
 0x2a6   :  { %v647_v39 = vmax.f32 %v3150_v33, %v3152_v36 }
 0x2a8   :  { %648 = vmax.xlane.f32.xlu0 %v647_v39  ;;  %v3156_v42 = vpop.f32.mrb[50].mxu1 }
 0x2a9   :  { %v3158_v45 = vpop.f32.mrb[51].mxu1 }
 0x2aa   :  { %3741 = vst [vmem:[#allocation10_spill] sm:$0xff] %v3158_v45  ;;  %v650_v48 = vmax.f32 %v3156_v42, %v3158_v45 }
 0x2ac   :  { %651 = vmax.xlane.f32.xlu0 %v650_v48  ;;  %v3162_v51 = vpop.f32.mrb[52].mxu1 }
 0x2ad   :  { %3742 = vst [vmem:[#allocation11_spill] sm:$0xff] %v3162_v51  ;;  %v3164_v54 = vpop.f32.mrb[53].mxu1 }
 0x2ae   :  { %3743 = vst [vmem:[#allocation12_spill] sm:$0xff] %v3164_v54  ;;  %v653_v63 = vmax.f32 %v3162_v51, %v3164_v54 }
 0x2b0   :  { %654 = vmax.xlane.f32.xlu0 %v653_v63  ;;  %v3168_v10 = vpop.f32.mrb[54].mxu1 }
 0x2b1   :  { %3744 = vst [vmem:[#allocation13_spill] sm:$0xff] %v3168_v10  ;;  %v3170_v21 = vpop.f32.mrb[55].mxu1 }
 0x2b2   :  { %3745 = vst [vmem:[#allocation14_spill] sm:$0xff] %v3170_v21  ;;  %v656_v30 = vmax.f32 %v3168_v10, %v3170_v21 }
 0x2b4   :  { %657 = vmax.xlane.f32.xlu0 %v656_v30  ;;  %v3174_v39 = vpop.f32.mrb[56].mxu1 }
 0x2b5   :  { %3746 = vst [vmem:[#allocation15_spill] sm:$0xff] %v3174_v39  ;;  %v3176_v1 = vpop.f32.mrb[57].mxu1 }
 0x2b6   :  { %3747 = vst [vmem:[#allocation16_spill] sm:$0xff] %v3176_v1  ;;  %v659_v48 = vmax.f32 %v3174_v39, %v3176_v1 }
 0x2b8   :  { %660 = vmax.xlane.f32.xlu0 %v659_v48  ;;  %v3180_v0 = vpop.f32.mrb[58].mxu1 }
 0x2b9   :  { %3748 = vst [vmem:[#allocation17_spill] sm:$0xff] %v3180_v0  ;;  %v3182_v17 = vpop.f32.mrb[59].mxu1 }
 0x2ba   :  { %3749 = vst [vmem:[#allocation18_spill] sm:$0xff] %v3182_v17  ;;  %v662_v63 = vmax.f32 %v3180_v0, %v3182_v17  ;;  %v40_v0 = vld [vmem:[%s3697_s2 + $0x10] sm:$0xff] }
 0x2bc   :  { %663 = vmax.xlane.f32.xlu0 %v662_v63  ;;  %v3186_v12 = vpop.f32.mrb[60].mxu1 }
 0x2bd   :  { %3750 = vst [vmem:[#allocation19_spill] sm:$0xff] %v3186_v12  ;;  %v3188_v21 = vpop.f32.mrb[61].mxu1 }
 0x2be   :  { %3751 = vst [vmem:[#allocation20_spill] sm:$0xff] %v3188_v21  ;;  %v665_v30 = vmax.f32 %v3186_v12, %v3188_v21  ;;  %v3203_v21 = vpop.f32.mrb[4].mxu0 }
 0x2bf   :  { %3754 = vst [vmem:[#allocation23_spill] sm:$0xff] %v3203_v21  ;;  %v3205_v51 = vpop.f32.mrb[5].mxu0 }
 0x2c0   :  { %666 = vmax.xlane.f32.xlu0 %v665_v30  ;;  %v3192_v10 = vpop.f32.mrb[62].mxu1  ;;  %3755 = vst [vmem:[#allocation24_spill] sm:$0xff] %v3205_v51 }
 0x2c1   :  { %3752 = vst [vmem:[#allocation21_spill] sm:$0xff] %v3192_v10  ;;  %v3194_v1 = vpop.f32.mrb[63].mxu1 }
 0x2c2   :  { %3753 = vst [vmem:[#allocation22_spill] sm:$0xff] %v3194_v1  ;;  %v668_v48 = vmax.f32 %v3192_v10, %v3194_v1 }
 0x2c4   :  { %669 = vmax.xlane.f32.xlu0 %v668_v48 }
 0x2d5   :  { %v577_v39 = vpop.xlane.xlu0 %576 }
 0x2d6   :  { %v671_v17 = vsub.f32 %v3006_v55, %v577_v39  ;;  %v672_v63 = vsub.f32 %v3008_v56, %v577_v39 }
 0x2d8   :  { %v735_v54 = vmul.f32 1.442695, %v671_v17  ;;  %v737_v30 = vmul.f32 1.442695, %v672_v63 }
 0x2d9   :  { %v580_v12 = vpop.xlane.xlu0 %579 }
 0x2da   :  { %v673_v45 = vsub.f32 %v3012_v58, %v580_v12  ;;  %v674_v48 = vsub.f32 %v3014_v59, %v580_v12  ;;  %61 = vperm.xlu0 %2533, %v40_v0   ;;  %2535 = vpow2.f32 %v735_v54 }
 0x2db   :  { %2537 = vpow2.f32 %v737_v30 }
 0x2dc   :  { %v739_v55 = vmul.f32 1.442695, %v673_v45  ;;  %v741_v1 = vmul.f32 1.442695, %v674_v48 }
 0x2dd   :  { %v583_v56 = vpop.xlane.xlu0 %582 }
 0x2de   :  { %2539 = vpow2.f32 %v739_v55  ;;  %v675_v39 = vsub.f32 %v3018_v61, %v583_v56  ;;  %v676_v17 = vsub.f32 %v3020_v62, %v583_v56 }
 0x2df   :  { %2541 = vpow2.f32 %v741_v1  ;;  %v3721_v1 = vmov 1.0  }
 0x2e0   :  { %v743_v63 = vmul.f32 1.442695, %v675_v39  ;;  %v745_v21 = vmul.f32 1.442695, %v676_v17  ;;  %998 = vmatprep.mubr.f32.mxu0 %v3721_v1 }
 0x2e1   :  { %v586_v10 = vpop.xlane.xlu0 %585 }
 0x2e2   :  { %v677_v51 = vsub.f32 %v3024_v2, %v586_v10  ;;  %v678_v58 = vsub.f32 %v3026_v3, %v586_v10  ;;  %2543 = vpow2.f32 %v743_v63 }
 0x2e3   :  { %2545 = vpow2.f32 %v745_v21 }
 0x2e4   :  { %v747_v0 = vmul.f32 1.442695, %v677_v51  ;;  %v749_v12 = vmul.f32 1.442695, %v678_v58  ;;  %v2536_v45 = vpop.eup %2535 }
 0x2e5   :  { %v589_v59 = vpop.xlane.xlu0 %588  ;;  %v2538_v62 = vpop.eup %2537 }
 0x2e6   :  { %2547 = vpow2.f32 %v747_v0  ;;  %v679_v54 = vsub.f32 %v3030_v5, %v589_v59  ;;  %v680_v61 = vsub.f32 %v3032_v6, %v589_v59 }
 0x2e7   :  { %2549 = vpow2.f32 %v749_v12 }
 0x2e8   :  { %v2540_v30 = vpop.eup %2539  ;;  %v751_v2 = vmul.f32 1.442695, %v679_v54  ;;  %v753_v3 = vmul.f32 1.442695, %v680_v61 }
 0x2e9   :  { %v2542_v48 = vpop.eup %2541  ;;  %v592_v10 = vpop.xlane.xlu0 %591  ;;  %v2268_v51 = vpack.c.bf16 %v2540_v30, %v2536_v45 }
 0x2ea   :  { %v681_v21 = vsub.f32 %v3036_v8, %v592_v10  ;;  %v682_v55 = vsub.f32 %v3038_v9, %v592_v10  ;;  %v2266_v56 = vpack.c.bf16 %v2542_v48, %v2538_v62  ;;  %2551 = vpow2.f32 %v751_v2 }
 0x2eb   :  { %2553 = vpow2.f32 %v753_v3 }
 0x2ec   :  { %v755_v5 = vmul.f32 1.442695, %v681_v21  ;;  %v757_v39 = vmul.f32 1.442695, %v682_v55  ;;  %2267 = vmatprep.subr.bf16.mxu1 %v2266_v56  ;;  %2331 = vmatprep.subr.bf16.mxu0 %v2266_v56  ;;  %v2544_v17 = vpop.eup %2543 }
 0x2ed   :  { %2269 = vmatpush1.bf16.xpose.msra.mxu1 %v2268_v51  ;;  %2333 = vmatpush1.bf16.xpose.msra.mxu0 %v2268_v51  ;;  %v595_v6 = vpop.xlane.xlu0 %594  ;;  %v2546_v0 = vpop.eup %2545 }
 0x2ee   :  { %2555 = vpow2.f32 %v755_v5  ;;  %v683_v63 = vsub.f32 %v3042_v11, %v595_v6  ;;  %v684_v58 = vsub.f32 %v3044_v13, %v595_v6 }
 0x2ef   :  { %2557 = vpow2.f32 %v757_v39 }
 0x2f0   :  { %v2548_v8 = vpop.eup %2547  ;;  %v759_v9 = vmul.f32 1.442695, %v683_v63  ;;  %v761_v59 = vmul.f32 1.442695, %v684_v58 }
 0x2f1   :  { %v2550_v12 = vpop.eup %2549  ;;  %v598_v45 = vpop.xlane.xlu0 %597  ;;  %v2272_v54 = vpack.c.bf16 %v2548_v8, %v2544_v17 }
 0x2f2   :  { %v685_v61 = vsub.f32 %v3048_v15, %v598_v45  ;;  %v686_v62 = vsub.f32 %v3050_v16, %v598_v45  ;;  %v2270_v30 = vpack.c.bf16 %v2550_v12, %v2546_v0  ;;  %2559 = vpow2.f32 %v759_v9 }
 0x2f3   :  { %2561 = vpow2.f32 %v761_v59 }
 0x2f4   :  { %v763_v2 = vmul.f32 1.442695, %v685_v61  ;;  %v765_v48 = vmul.f32 1.442695, %v686_v62  ;;  %2271 = vmatprep.subr.bf16.mxu1 %v2270_v30  ;;  %2335 = vmatprep.subr.bf16.mxu0 %v2270_v30  ;;  %v2552_v13 = vpop.eup %2551 }
 0x2f5   :  { %2273 = vmatpush1.bf16.xpose.msra.mxu1 %v2272_v54  ;;  %2337 = vmatpush1.bf16.xpose.msra.mxu0 %v2272_v54  ;;  %v601_v11 = vpop.xlane.xlu1 %600  ;;  %v2554_v51 = vpop.eup %2553 }
 0x2f6   :  { %2563 = vpow2.f32 %v763_v2  ;;  %v687_v3 = vsub.f32 %v3054_v19, %v601_v11  ;;  %v688_v10 = vsub.f32 %v3056_v20, %v601_v11 }
 0x2f7   :  { %2565 = vpow2.f32 %v765_v48 }
 0x2f8   :  { %v2556_v15 = vpop.eup %2555  ;;  %v767_v16 = vmul.f32 1.442695, %v687_v3  ;;  %v769_v55 = vmul.f32 1.442695, %v688_v10 }
 0x2f9   :  { %v2558_v21 = vpop.eup %2557  ;;  %v604_v56 = vpop.xlane.xlu0 %603  ;;  %v2276_v5 = vpack.c.bf16 %v2556_v15, %v2552_v13 }
 0x2fa   :  { %v689_v39 = vsub.f32 %v3060_v22, %v604_v56  ;;  %v690_v6 = vsub.f32 %v3062_v23, %v604_v56  ;;  %v2274_v17 = vpack.c.bf16 %v2558_v21, %v2554_v51  ;;  %2567 = vpow2.f32 %v767_v16 }
 0x2fb   :  { %2569 = vpow2.f32 %v769_v55 }
 0x2fc   :  { %v771_v63 = vmul.f32 1.442695, %v689_v39  ;;  %v773_v58 = vmul.f32 1.442695, %v690_v6  ;;  %2275 = vmatprep.subr.bf16.mxu1 %v2274_v17  ;;  %2339 = vmatprep.subr.bf16.mxu0 %v2274_v17  ;;  %v2560_v20 = vpop.eup %2559 }
 0x2fd   :  { %2277 = vmatpush1.bf16.xpose.msra.mxu1 %v2276_v5  ;;  %2341 = vmatpush1.bf16.xpose.msra.mxu0 %v2276_v5  ;;  %v607_v19 = vpop.xlane.xlu0 %606  ;;  %v2562_v9 = vpop.eup %2561 }
 0x2fe   :  { %2571 = vpow2.f32 %v771_v63  ;;  %v691_v0 = vsub.f32 %v3066_v25, %v607_v19  ;;  %v692_v8 = vsub.f32 %v3068_v26, %v607_v19 }
 0x2ff   :  { %2573 = vpow2.f32 %v773_v58 }
 0x300   :  { %v2564_v22 = vpop.eup %2563  ;;  %v775_v23 = vmul.f32 1.442695, %v691_v0  ;;  %v777_v59 = vmul.f32 1.442695, %v692_v8 }
 0x301   :  { %v2566_v12 = vpop.eup %2565  ;;  %v610_v45 = vpop.xlane.xlu0 %609  ;;  %v2280_v54 = vpack.c.bf16 %v2564_v22, %v2560_v20 }
 0x302   :  { %v693_v61 = vsub.f32 %v3072_v28, %v610_v45  ;;  %v694_v62 = vsub.f32 %v3074_v29, %v610_v45  ;;  %v2278_v30 = vpack.c.bf16 %v2566_v12, %v2562_v9  ;;  %2575 = vpow2.f32 %v775_v23 }
 0x303   :  { %2577 = vpow2.f32 %v777_v59 }
 0x304   :  { %v779_v2 = vmul.f32 1.442695, %v693_v61  ;;  %v781_v48 = vmul.f32 1.442695, %v694_v62  ;;  %2279 = vmatprep.subr.bf16.mxu1 %v2278_v30  ;;  %2343 = vmatprep.subr.bf16.mxu0 %v2278_v30  ;;  %v2568_v26 = vpop.eup %2567 }
 0x305   :  { %2281 = vmatpush1.bf16.xpose.msra.mxu1 %v2280_v54  ;;  %2345 = vmatpush1.bf16.xpose.msra.mxu0 %v2280_v54  ;;  %v613_v25 = vpop.xlane.xlu0 %612  ;;  %v2570_v3 = vpop.eup %2569 }
 0x306   :  { %2579 = vpow2.f32 %v779_v2  ;;  %v695_v11 = vsub.f32 %v3078_v31, %v613_v25  ;;  %v696_v13 = vsub.f32 %v3080_v32, %v613_v25 }
 0x307   :  { %2581 = vpow2.f32 %v781_v48 }
 0x308   :  { %v2572_v28 = vpop.eup %2571  ;;  %v783_v29 = vmul.f32 1.442695, %v695_v11  ;;  %v785_v51 = vmul.f32 1.442695, %v696_v13 }
 0x309   :  { %v2574_v10 = vpop.eup %2573  ;;  %v616_v15 = vpop.xlane.xlu0 %615  ;;  %v2284_v16 = vpack.c.bf16 %v2572_v28, %v2568_v26 }
 0x30a   :  { %v697_v21 = vsub.f32 %v3084_v34, %v616_v15  ;;  %v698_v55 = vsub.f32 %v3086_v35, %v616_v15  ;;  %v2282_v56 = vpack.c.bf16 %v2574_v10, %v2570_v3  ;;  %2583 = vpow2.f32 %v783_v29 }
 0x30b   :  { %2585 = vpow2.f32 %v785_v51 }
 0x30c   :  { %v787_v5 = vmul.f32 1.442695, %v697_v21  ;;  %v789_v39 = vmul.f32 1.442695, %v698_v55  ;;  %2283 = vmatprep.subr.bf16.mxu1 %v2282_v56  ;;  %2347 = vmatprep.subr.bf16.mxu0 %v2282_v56  ;;  %v2576_v32 = vpop.eup %2575 }
 0x30d   :  { %2285 = vmatpush1.bf16.xpose.msra.mxu1 %v2284_v16  ;;  %2349 = vmatpush1.bf16.xpose.msra.mxu0 %v2284_v16  ;;  %v619_v31 = vpop.xlane.xlu0 %618  ;;  %v2578_v63 = vpop.eup %2577 }
 0x30e   :  { %2587 = vpow2.f32 %v787_v5  ;;  %v699_v6 = vsub.f32 %v3090_v37, %v619_v31  ;;  %v700_v17 = vsub.f32 %v3092_v38, %v619_v31 }
 0x30f   :  { %2589 = vpow2.f32 %v789_v39 }
 0x310   :  { %v2580_v34 = vpop.eup %2579  ;;  %v791_v35 = vmul.f32 1.442695, %v699_v6  ;;  %v793_v19 = vmul.f32 1.442695, %v700_v17 }
 0x311   :  { %v2582_v58 = vpop.eup %2581  ;;  %v622_v20 = vpop.xlane.xlu0 %621  ;;  %v2288_v0 = vpack.c.bf16 %v2580_v34, %v2576_v32 }
 0x312   :  { %v701_v8 = vsub.f32 %v3096_v40, %v622_v20  ;;  %v702_v9 = vsub.f32 %v3098_v41, %v622_v20  ;;  %v2286_v22 = vpack.c.bf16 %v2582_v58, %v2578_v63  ;;  %2591 = vpow2.f32 %v791_v35 }
 0x313   :  { %2593 = vpow2.f32 %v793_v19 }
 0x314   :  { %v795_v23 = vmul.f32 1.442695, %v701_v8  ;;  %v797_v12 = vmul.f32 1.442695, %v702_v9  ;;  %2287 = vmatprep.subr.bf16.mxu1 %v2286_v22  ;;  %2351 = vmatprep.subr.bf16.mxu0 %v2286_v22  ;;  %v2584_v38 = vpop.eup %2583 }
 0x315   :  { %2289 = vmatpush1.bf16.xpose.msra.mxu1 %v2288_v0  ;;  %2353 = vmatpush1.bf16.xpose.msra.mxu0 %v2288_v0  ;;  %v625_v37 = vpop.xlane.xlu0 %624  ;;  %v2586_v54 = vpop.eup %2585 }
 0x316   :  { %2595 = vpow2.f32 %v795_v23  ;;  %v703_v59 = vsub.f32 %v3102_v43, %v625_v37  ;;  %v704_v45 = vsub.f32 %v3104_v44, %v625_v37 }
 0x317   :  { %2597 = vpow2.f32 %v797_v12 }
 0x318   :  { %v2588_v40 = vpop.eup %2587  ;;  %v799_v41 = vmul.f32 1.442695, %v703_v59  ;;  %v801_v62 = vmul.f32 1.442695, %v704_v45 }
 0x319   :  { %v2590_v61 = vpop.eup %2589  ;;  %v628_v30 = vpop.xlane.xlu0 %627  ;;  %v2292_v2 = vpack.c.bf16 %v2588_v40, %v2584_v38 }
 0x31a   :  { %v705_v48 = vsub.f32 %v3108_v46, %v628_v30  ;;  %v706_v25 = vsub.f32 %v3110_v47, %v628_v30  ;;  %v2290_v26 = vpack.c.bf16 %v2590_v61, %v2586_v54  ;;  %2599 = vpow2.f32 %v799_v41 }
 0x31b   :  { %2601 = vpow2.f32 %v801_v62 }
 0x31c   :  { %v803_v11 = vmul.f32 1.442695, %v705_v48  ;;  %v805_v13 = vmul.f32 1.442695, %v706_v25  ;;  %2291 = vmatprep.subr.bf16.mxu1 %v2290_v26  ;;  %2355 = vmatprep.subr.bf16.mxu0 %v2290_v26  ;;  %v2592_v44 = vpop.eup %2591 }
 0x31d   :  { %2293 = vmatpush1.bf16.xpose.msra.mxu1 %v2292_v2  ;;  %2357 = vmatpush1.bf16.xpose.msra.mxu0 %v2292_v2  ;;  %v631_v43 = vpop.xlane.xlu0 %630  ;;  %v2594_v29 = vpop.eup %2593 }
 0x31e   :  { %2603 = vpow2.f32 %v803_v11  ;;  %v707_v3 = vsub.f32 %v3114_v49, %v631_v43  ;;  %v708_v28 = vsub.f32 %v3116_v50, %v631_v43  ;;  %v3756_v43 = vld [vmem:[#allocation10_spill] sm:$0xff] }
 0x31f   :  { %2605 = vpow2.f32 %v805_v13 }
 0x320   :  { %v2596_v46 = vpop.eup %2595  ;;  %v807_v47 = vmul.f32 1.442695, %v707_v3  ;;  %v809_v51 = vmul.f32 1.442695, %v708_v28 }
 0x321   :  { %v2598_v10 = vpop.eup %2597  ;;  %v634_v15 = vpop.xlane.xlu0 %633  ;;  %v2296_v16 = vpack.c.bf16 %v2596_v46, %v2592_v44  ;;  %v3757_v46 = vld [vmem:[#allocation11_spill] sm:$0xff] }
 0x322   :  { %v709_v21 = vsub.f32 %v3120_v52, %v634_v15  ;;  %v710_v55 = vsub.f32 %v3122_v53, %v634_v15  ;;  %v2294_v56 = vpack.c.bf16 %v2598_v10, %v2594_v29  ;;  %2607 = vpow2.f32 %v807_v47  ;;  %v3758_v10 = vld [vmem:[#allocation12_spill] sm:$0xff] }
 0x323   :  { %2609 = vpow2.f32 %v809_v51 }
 0x324   :  { %v811_v5 = vmul.f32 1.442695, %v709_v21  ;;  %v813_v39 = vmul.f32 1.442695, %v710_v55  ;;  %2295 = vmatprep.subr.bf16.mxu1 %v2294_v56  ;;  %2359 = vmatprep.subr.bf16.mxu0 %v2294_v56  ;;  %v2600_v50 = vpop.eup %2599 }
 0x325   :  { %2297 = vmatpush1.bf16.xpose.msra.mxu1 %v2296_v16  ;;  %2361 = vmatpush1.bf16.xpose.msra.mxu0 %v2296_v16  ;;  %v637_v49 = vpop.xlane.xlu0 %636  ;;  %v2602_v6 = vpop.eup %2601 }
 0x326   :  { %2611 = vpow2.f32 %v811_v5  ;;  %v711_v31 = vsub.f32 %v3126_v57, %v637_v49  ;;  %v712_v32 = vsub.f32 %v3128_v60, %v637_v49 }
 0x327   :  { %2613 = vpow2.f32 %v813_v39  ;;  %v3759_v39 = vld [vmem:[#allocation13_spill] sm:$0xff] }
 0x328   :  { %v2604_v52 = vpop.eup %2603  ;;  %v815_v53 = vmul.f32 1.442695, %v711_v31  ;;  %v817_v63 = vmul.f32 1.442695, %v712_v32 }
 0x329   :  { %v2606_v17 = vpop.eup %2605  ;;  %v640_v34 = vpop.xlane.xlu0 %639  ;;  %v2300_v35 = vpack.c.bf16 %v2604_v52, %v2600_v50  ;;  %v3760_v50 = vld [vmem:[#allocation14_spill] sm:$0xff] }
 0x32a   :  { %v713_v58 = vsub.f32 %v3132_v4, %v640_v34  ;;  %v714_v19 = vsub.f32 %v3134_v7, %v640_v34  ;;  %v2298_v20 = vpack.c.bf16 %v2606_v17, %v2602_v6  ;;  %2615 = vpow2.f32 %v815_v53 }
 0x32b   :  { %2617 = vpow2.f32 %v817_v63  ;;  %v3761_v63 = vld [vmem:[#allocation15_spill] sm:$0xff] }
 0x32c   :  { %v819_v0 = vmul.f32 1.442695, %v713_v58  ;;  %v821_v8 = vmul.f32 1.442695, %v714_v19  ;;  %2299 = vmatprep.subr.bf16.mxu1 %v2298_v20  ;;  %2363 = vmatprep.subr.bf16.mxu0 %v2298_v20  ;;  %v2608_v60 = vpop.eup %2607 }
 0x32d   :  { %2301 = vmatpush1.bf16.xpose.msra.mxu1 %v2300_v35  ;;  %2365 = vmatpush1.bf16.xpose.msra.mxu0 %v2300_v35  ;;  %v643_v57 = vpop.xlane.xlu0 %642  ;;  %v2610_v23 = vpop.eup %2609  ;;  %v3762_v35 = vld [vmem:[#allocation16_spill] sm:$0xff] }
 0x32e   :  { %2619 = vpow2.f32 %v819_v0  ;;  %v715_v9 = vsub.f32 %v3138_v14, %v643_v57  ;;  %v716_v22 = vsub.f32 %v3140_v18, %v643_v57 }
 0x32f   :  { %2621 = vpow2.f32 %v821_v8 }
 0x330   :  { %v2612_v4 = vpop.eup %2611  ;;  %v823_v7 = vmul.f32 1.442695, %v715_v9  ;;  %v825_v37 = vmul.f32 1.442695, %v716_v22  ;;  %v3763_v22 = vld [vmem:[#allocation17_spill] sm:$0xff] }
 0x331   :  { %v2614_v12 = vpop.eup %2613  ;;  %v646_v38 = vpop.xlane.xlu0 %645  ;;  %v2304_v59 = vpack.c.bf16 %v2612_v4, %v2608_v60  ;;  %v3764_v4 = vld [vmem:[#allocation18_spill] sm:$0xff] }
 0x332   :  { %v717_v45 = vsub.f32 %v3144_v24, %v646_v38  ;;  %v718_v54 = vsub.f32 %v3146_v27, %v646_v38  ;;  %v2302_v40 = vpack.c.bf16 %v2614_v12, %v2610_v23  ;;  %2623 = vpow2.f32 %v823_v7 }
 0x333   :  { %2625 = vpow2.f32 %v825_v37 }
 0x334   :  { %v827_v41 = vmul.f32 1.442695, %v717_v45  ;;  %v829_v61 = vmul.f32 1.442695, %v718_v54  ;;  %2303 = vmatprep.subr.bf16.mxu1 %v2302_v40  ;;  %2367 = vmatprep.subr.bf16.mxu0 %v2302_v40  ;;  %v2616_v18 = vpop.eup %2615  ;;  %v3765_v54 = vld [vmem:[#allocation19_spill] sm:$0xff] }
 0x335   :  { %2305 = vmatpush1.bf16.xpose.msra.mxu1 %v2304_v59  ;;  %2369 = vmatpush1.bf16.xpose.msra.mxu0 %v2304_v59  ;;  %v649_v14 = vpop.xlane.xlu0 %648  ;;  %v2618_v2 = vpop.eup %2617 }
 0x336   :  { %2627 = vpow2.f32 %v827_v41  ;;  %v719_v62 = vsub.f32 %v3150_v33, %v649_v14  ;;  %v720_v30 = vsub.f32 %v3152_v36, %v649_v14  ;;  %v3766_v41 = vld [vmem:[#allocation20_spill] sm:$0xff] }
 0x337   :  { %2629 = vpow2.f32 %v829_v61 }
 0x338   :  { %v2620_v24 = vpop.eup %2619  ;;  %v831_v27 = vmul.f32 1.442695, %v719_v62  ;;  %v833_v25 = vmul.f32 1.442695, %v720_v30 }
 0x339   :  { %v2622_v48 = vpop.eup %2621  ;;  %v652_v26 = vpop.xlane.xlu0 %651  ;;  %v2308_v11 = vpack.c.bf16 %v2620_v24, %v2616_v18 }
 0x33a   :  { %v721_v13 = vsub.f32 %v3156_v42, %v652_v26  ;;  %v722_v44 = vsub.f32 %v3756_v43, %v652_v26  ;;  %v2306_v3 = vpack.c.bf16 %v2622_v48, %v2618_v2  ;;  %2631 = vpow2.f32 %v831_v27  ;;  %v3767_v48 = vld [vmem:[#allocation21_spill] sm:$0xff]  ;;  %v3768_v26 = vld [vmem:[#allocation22_spill] sm:$0xff] }
 0x33b   :  { %2633 = vpow2.f32 %v833_v25 }
 0x33c   :  { %v835_v28 = vmul.f32 1.442695, %v721_v13  ;;  %v837_v29 = vmul.f32 1.442695, %v722_v44  ;;  %2307 = vmatprep.subr.bf16.mxu1 %v2306_v3  ;;  %2371 = vmatprep.subr.bf16.mxu0 %v2306_v3  ;;  %v2624_v36 = vpop.eup %2623 }
 0x33d   :  { %2309 = vmatpush1.bf16.xpose.msra.mxu1 %v2308_v11  ;;  %2373 = vmatpush1.bf16.xpose.msra.mxu0 %v2308_v11  ;;  %v655_v33 = vpop.xlane.xlu0 %654  ;;  %v2626_v15 = vpop.eup %2625 }
 0x33e   :  { %2635 = vpow2.f32 %v835_v28  ;;  %v723_v47 = vsub.f32 %v3757_v46, %v655_v33  ;;  %v724_v51 = vsub.f32 %v3758_v10, %v655_v33  ;;  %v3770_v10 = vld [vmem:[#allocation24_spill] sm:$0xff] }
 0x33f   :  { %2637 = vpow2.f32 %v837_v29 }
 0x340   :  { %v2628_v42 = vpop.eup %2627  ;;  %v839_v16 = vmul.f32 1.442695, %v723_v47  ;;  %v841_v55 = vmul.f32 1.442695, %v724_v51 }
 0x341   :  { %v2630_v21 = vpop.eup %2629  ;;  %v658_v56 = vpop.xlane.xlu0 %657  ;;  %v2312_v5 = vpack.c.bf16 %v2628_v42, %v2624_v36 }
 0x342   :  { %v725_v49 = vsub.f32 %v3759_v39, %v658_v56  ;;  %v726_v31 = vsub.f32 %v3760_v50, %v658_v56  ;;  %v2310_v32 = vpack.c.bf16 %v2630_v21, %v2626_v15  ;;  %2639 = vpow2.f32 %v839_v16  ;;  %v1130_v21 = vld [vmem:[#allocation2 + $0x28] sm:$0xff]  ;;  %v1129_v50 = vld [vmem:[#allocation2 + $0x20] sm:$0xff] }
 0x343   :  { %2641 = vpow2.f32 %v841_v55  ;;  %v1132_v55 = vld [vmem:[#allocation2 + $0x38] sm:$0xff] }
 0x344   :  { %v843_v6 = vmul.f32 1.442695, %v725_v49  ;;  %v845_v52 = vmul.f32 1.442695, %v726_v31  ;;  %2311 = vmatprep.subr.bf16.mxu1 %v2310_v32  ;;  %2375 = vmatprep.subr.bf16.mxu0 %v2310_v32  ;;  %v2632_v17 = vpop.eup %2631  ;;  %v2394_v49 = vpack.c.bf16 %v1132_v55, %v1130_v21  ;;  %v1131_v31 = vld [vmem:[#allocation2 + $0x30] sm:$0xff]  ;;  %v3771_v32 = vld [vmem:[#allocation23_spill] sm:$0xff] }
 0x345   :  { %2313 = vmatpush1.bf16.xpose.msra.mxu1 %v2312_v5  ;;  %2377 = vmatpush1.bf16.xpose.msra.mxu0 %v2312_v5  ;;  %v661_v53 = vpop.xlane.xlu0 %660  ;;  %v2634_v19 = vpop.eup %2633 }
 0x346   :  { %2643 = vpow2.f32 %v843_v6  ;;  %v727_v34 = vsub.f32 %v3761_v63, %v661_v53  ;;  %v728_v58 = vsub.f32 %v3762_v35, %v661_v53  ;;  %v3772_v53 = vmov 0.0   ;;  %v2800_v63 = vld [vmem:[%s3696_s1 + $0x8] sm:$0xff] }
 0x347   :  { %2645 = vpow2.f32 %v845_v52  ;;  %v2396_v52 = vpack.c.bf16 %v1131_v31, %v1129_v50 }
 0x348   :  { %v2636_v20 = vpop.eup %2635  ;;  %v847_v0 = vmul.f32 1.442695, %v727_v34  ;;  %v849_v57 = vmul.f32 1.442695, %v728_v58  ;;  %v2801_v34 = vld [vmem:[%s3696_s1 + $0x10] sm:$0xff] }
 0x349   :  { %v2638_v8 = vpop.eup %2637  ;;  %v664_v60 = vpop.xlane.xlu0 %663  ;;  %v2316_v9 = vpack.c.bf16 %v2636_v20, %v2632_v17  ;;  %v2799_v17 = vld [vmem:[%s3696_s1] sm:$0xff] }
 0x34a   :  { %v729_v23 = vsub.f32 %v3763_v22, %v664_v60  ;;  %v730_v7 = vsub.f32 %v3764_v4, %v664_v60  ;;  %v2314_v12 = vpack.c.bf16 %v2638_v8, %v2634_v19  ;;  %2647 = vpow2.f32 %v847_v0  ;;  %v3773_v8 = vld [vmem:[#allocation8_spill] sm:$0xff] }
 0x34b   :  { %2649 = vpow2.f32 %v849_v57 }
 0x34c   :  { %v851_v37 = vmul.f32 1.442695, %v729_v23  ;;  %v853_v38 = vmul.f32 1.442695, %v730_v7  ;;  %2315 = vmatprep.subr.bf16.mxu1 %v2314_v12  ;;  %2379 = vmatprep.subr.bf16.mxu0 %v2314_v12  ;;  %v2640_v45 = vpop.eup %2639 }
 0x34d   :  { %2317 = vmatpush1.bf16.xpose.msra.mxu1 %v2316_v9  ;;  %2381 = vmatpush1.bf16.xpose.msra.mxu0 %v2316_v9  ;;  %v667_v59 = vpop.xlane.xlu0 %666  ;;  %v2642_v14 = vpop.eup %2641  ;;  %v1013_v9 = vlaneseq }
 0x34e   :  { %2651 = vpow2.f32 %v851_v37  ;;  %v731_v40 = vsub.f32 %v3765_v54, %v667_v59  ;;  %v732_v61 = vsub.f32 %v3766_v41, %v667_v59 }
 0x34f   :  { %2653 = vpow2.f32 %v853_v38  ;;  %v1014_v7 = vshrl.u32 %v1013_v9, 7 }
 0x350   :  { %v2644_v18 = vpop.eup %2643  ;;  %v855_v62 = vmul.f32 1.442695, %v731_v40  ;;  %v857_v2 = vmul.f32 1.442695, %v732_v61 }
 0x351   :  { %v2646_v30 = vpop.eup %2645  ;;  %v670_v24 = vpop.xlane.xlu0 %669  ;;  %v2320_v27 = vpack.c.bf16 %v2644_v18, %v2640_v45  ;;  %v3297_v41 = vsub.s32 0, %v1014_v7 }
 0x352   :  { %v733_v25 = vsub.f32 %v3767_v48, %v670_v24  ;;  %v734_v11 = vsub.f32 %v3768_v26, %v670_v24  ;;  %v2318_v13 = vpack.c.bf16 %v2646_v30, %v2642_v14  ;;  %2655 = vpow2.f32 %v855_v62  ;;  %v41_v48 = vld [vmem:[%s3698_s3] sm:$0xff] }
 0x353   :  { %2657 = vpow2.f32 %v857_v2  ;;  %3775 = vst [vmem:[#allocation12_spill] sm:$0xff] %v3297_v41 }
 0x354   :  { %v859_v43 = vmul.f32 1.442695, %v733_v25  ;;  %v861_v44 = vmul.f32 1.442695, %v734_v11  ;;  %2319 = vmatprep.subr.bf16.mxu1 %v2318_v13  ;;  %2383 = vmatprep.subr.bf16.mxu0 %v2318_v13  ;;  %v2648_v3 = vpop.eup %2647  ;;  %v3776_v25 = vld [vmem:[#allocation9_spill] sm:$0xff] }
 0x355   :  { %2321 = vmatpush1.bf16.xpose.msra.mxu1 %v2320_v27  ;;  %2385 = vmatpush1.bf16.xpose.msra.mxu0 %v2320_v27  ;;  %v2650_v28 = vpop.eup %2649  ;;  %v42_v13 = vld [vmem:[%s3698_s3 + $0x8] sm:$0xff] }
 0x356   :  { %2659 = vpow2.f32 %v859_v43  ;;  %v3777_v43 = vmov 0  }
 0x357   :  { %2661 = vpow2.f32 %v861_v44 }
 0x358   :  { %v2652_v29 = vpop.eup %2651 }
 0x359   :  { %v2654_v33 = vpop.eup %2653  ;;  %v3270_v36 = vpop.permute.xlu0 %61  ;;  %v2324_v46 = vpack.c.bf16 %v2652_v29, %v2648_v3 }
 0x35a   :  { %3769 = vst [vmem:[#allocation10_spill] sm:$0xff] %v3270_v36  ;;  %v2322_v47 = vpack.c.bf16 %v2654_v33, %v2650_v28  ;;  %v155_v51 = vadd.f32 %v3770_v10, %v3270_v36  ;;  %v153_v6 = vadd.f32 %v3771_v32, %v3270_v36 }
 0x35c   :  { %2323 = vmatprep.subr.bf16.mxu1 %v2322_v47  ;;  %2387 = vmatprep.subr.bf16.mxu0 %v2322_v47  ;;  %v2656_v15 = vpop.eup %2655 }
 0x35d   :  { %2325 = vmatpush1.bf16.xpose.msra.mxu1 %v2324_v46  ;;  %927 = vmatprep.mubr.f32.mxu1 %v155_v51  ;;  %v2658_v42 = vpop.eup %2657 }
 0x35e   :  { %2389 = vmatpush1.bf16.xpose.msra.mxu0 %v2324_v46 }
 0x360   :  { %v2660_v16 = vpop.eup %2659 }
 0x361   :  { %v2662_v56 = vpop.eup %2661  ;;  %v2328_v5 = vpack.c.bf16 %v2660_v16, %v2656_v15 }
 0x362   :  { %v2326_v39 = vpack.c.bf16 %v2662_v56, %v2658_v42 }
 0x364   :  { %2327 = vmatprep.subr.bf16.mxu1 %v2326_v39  ;;  %2391 = vmatprep.subr.bf16.mxu0 %v2326_v39 }
 0x365   :  { %2329 = vmatpush1.bf16.xpose.msra.mxu1 %v2328_v5 }
 0x366   :  { %2393 = vmatpush1.bf16.xpose.msra.mxu0 %v2328_v5 }
 0x367   :  { %2395 = vmatprep.subr.bf16.mxu0 %v2394_v49 }
 0x36c   :  { %928 = vmatmul.mubr.f32.vlgmr.msra.gmra.mrb[64].mxu1 %v153_v6 }
 0x36d   :  { %999 = vmatmul.mubr.f32.vlgmr.msra.gmra.mrb[6].mxu0 %v3721_v1  ;;  %1093 = vmatprep.mubr.f32.mxu1 %v3772_v53 }
 0x36e   :  { %2397 = vmatpush1.bf16.msra.mxu0 %v2396_v52  ;;  %1197 = vmatprep.mubr.f32.mxu0 %v3772_v53 }
 0x371   :  { %2225 = vmatmul.mubr.msk.f32.vlgmr.msra.gmra.mrb[8].mxu0 %vm64_vm0, %v2799_v17 }
 0x372   :  { %1203 = vmatprep.mubr.f32.mxu0 %v3772_v53 }
 0x375   :  { %2226 = vmatmul.mubr.msk.f32.gmra.mrb[10].mxu0 %vm64_vm0, %v2800_v63 }
 0x376   :  { %1209 = vmatprep.mubr.f32.mxu0 %v3772_v53 }
 0x379   :  { %2227 = vmatmul.mubr.msk.f32.gmra.mrb[12].mxu0 %vm64_vm0, %v2801_v34 }
 0x43f   :  { %v929_v35 = vpop.f32.mrb[64].mxu1 }
 0x440   :  { %v1000_v58 = vpop.f32.mrb[6].mxu0  ;;  %v931_v19 = vpop.f32.mrb[65].mxu1 }
 0x441   :  { %2663 = vrcp.f32 %v1000_v58  ;;  %v1002_v20 = vpop.f32.mrb[7].mxu0 }
 0x442   :  { %2665 = vrcp.f32 %v1002_v20 }
 0x444   :  { %v1199_v0 = vpop.f32.mrb[8].mxu0 }
 0x445   :  { %v1200_v57 = vadd.f32 %v1199_v0, %v3773_v8  ;;  %v1201_v60 = vpop.f32.mrb[9].mxu0 }
 0x446   :  { %v1202_v22 = vadd.f32 %v1201_v60, %v3773_v8 }
 0x447   :  { %1216 = vxpose.xlu1.b32.start.end [1/1] (short) %v1200_v57, 128 }
 0x448   :  { %v1205_v23 = vpop.f32.mrb[10].mxu0  ;;  %1248 = vxpose.xlu0.b32.start.end [1/1] (short) %v1202_v22, 128 }
 0x449   :  { %v1207_v4 = vpop.f32.mrb[11].mxu0  ;;  %v1206_v11 = vadd.f32 %v1205_v23, %v3776_v25 }
 0x44a   :  { %v1208_v26 = vadd.f32 %v1207_v4, %v3776_v25 }
 0x44b   :  { %v2664_v12 = vpop.eup %2663 }
 0x44c   :  { %v2666_v37 = vpop.eup %2665  ;;  %v1007_v38 = vmul.f32 %v2664_v12, %v1000_v58  ;;  %v3295_v59 = vpop.f32.mrb[12].mxu0 }
 0x44d   :  { %3774 = vst [vmem:[#allocation11_spill] sm:$0xff] %v3295_v59  ;;  %v1008_v45 = vmul.f32 %v2666_v37, %v1002_v20  ;;  %v1213_v54 = vpop.f32.mrb[13].mxu0 }
 0x44e   :  { %v1009_v40 = vsub.f32 2.0, %v1007_v38  ;;  %v1214_v61 = vadd.f32 %v1213_v54, %v3270_v36 }
 0x44f   :  { %v1010_v14 = vsub.f32 2.0, %v1008_v45 }
 0x450   :  { %v1011_v18 = vmul.f32 %v2664_v12, %v1009_v40  ;;  %1985 = vmatprep.mubr.f32.mxu0 %v1214_v61 }
 0x451   :  { %v1012_v62 = vmul.f32 %v2666_v37, %v1010_v14 }
 0x452   :  { %v1016_v30 = vrot.slane %v1011_v18, %v3297_v41 }
 0x453   :  { %v1020_v2 = vrot.slane %v1012_v62, %v3297_v41 }
 0x454   :  { %v1021_v24 = vmul.f32 %v1016_v30, %v929_v35 }
 0x455   :  { %v1022_v27 = vmul.f32 %v1020_v2, %v931_v19 }
 0x457   :  { %1029 = vmatprep.subr.mxu1 %v1022_v27 }
 0x458   :  { %1030 = vmatpush1.msra.mxu1 %v1021_v24 }
 0x459   :  { %1376 = vmatprep.subr.mxu1 %v1208_v26  ;;  %2223 = vmatmul.mubr.msk.f32.vlgmr.msra.gmra.mrb[66].mxu1 %vm221_vm1, %v41_v48 }
 0x45a   :  { %1377 = vmatpush1.msra.mxu1 %v1206_v11  ;;  %1099 = vmatprep.mubr.f32.mxu1 %v3772_v53 }
 0x45d   :  { %2224 = vmatmul.mubr.msk.f32.gmra.mrb[68].mxu1 %vm221_vm1, %v42_v13 }
 0x45e   :  { %1440 = vmatprep.mubr.f32.mxu1 %v3772_v53 }
 0x465   :  { %2534 = vset.pattern.permute.xlu1 %v3777_v43 }
 0x4c7   :  { %v1232_v44 = vpop.trf.xlu1 }
 0x4c8   :  { %2228 = vmatmul.mubr.msk.f32.vlgmr.msra.gmra.mrb[70].mxu1 %vm221_vm1, %v1232_v44  ;;  %v1264_v15 = vpop.trf.xlu0 }
 0x4c9   :  { %1446 = vmatprep.mubr.f32.mxu1 %v3772_v53 }
 0x4cb   :  { %v1233_v3 = vpop.trf.xlu1 }
 0x4cc   :  { %2229 = vmatmul.mubr.msk.f32.gmra.mrb[72].mxu1 %vm221_vm1, %v1233_v3  ;;  %v1265_v16 = vpop.trf.xlu0 }
 0x4cd   :  { %1452 = vmatprep.mubr.f32.mxu1 %v3772_v53 }
 0x4cf   :  { %v1234_v28 = vpop.trf.xlu1 }
 0x4d0   :  { %2230 = vmatmul.mubr.msk.f32.gmra.mrb[74].mxu1 %vm221_vm1, %v1234_v28  ;;  %v1266_v56 = vpop.trf.xlu0 }
 0x4d1   :  { %1458 = vmatprep.mubr.f32.mxu1 %v3772_v53 }
 0x4d3   :  { %v1235_v29 = vpop.trf.xlu1 }
 0x4d4   :  { %2231 = vmatmul.mubr.msk.f32.gmra.mrb[76].mxu1 %vm221_vm1, %v1235_v29  ;;  %v1267_v39 = vpop.trf.xlu0 }
 0x4d5   :  { %1464 = vmatprep.mubr.f32.mxu1 %v3772_v53 }
 0x4d7   :  { %v1236_v33 = vpop.trf.xlu1 }
 0x4d8   :  { %2232 = vmatmul.mubr.msk.f32.gmra.mrb[78].mxu1 %vm221_vm1, %v1236_v33  ;;  %v1268_v31 = vpop.trf.xlu0 }
 0x4d9   :  { %1470 = vmatprep.mubr.f32.mxu1 %v3772_v53 }
 0x4db   :  { %v1237_v46 = vpop.trf.xlu1 }
 0x4dc   :  { %2233 = vmatmul.mubr.msk.f32.gmra.mrb[80].mxu1 %vm221_vm1, %v1237_v46  ;;  %v1269_v6 = vpop.trf.xlu0 }
 0x4dd   :  { %1476 = vmatprep.mubr.f32.mxu1 %v3772_v53 }
 0x4df   :  { %v1238_v47 = vpop.trf.xlu1 }
 0x4e0   :  { %2234 = vmatmul.mubr.msk.f32.gmra.mrb[82].mxu1 %vm221_vm1, %v1238_v47  ;;  %v1270_v52 = vpop.trf.xlu0 }
 0x4e1   :  { %1482 = vmatprep.mubr.f32.mxu1 %v3772_v53 }
 0x4e3   :  { %v1239_v10 = vpop.trf.xlu1 }
 0x4e4   :  { %2235 = vmatmul.mubr.msk.f32.gmra.mrb[84].mxu1 %vm221_vm1, %v1239_v10  ;;  %v1271_v17 = vpop.trf.xlu0 }
 0x4e5   :  { %1488 = vmatprep.mubr.f32.mxu1 %v3772_v53 }
 0x4e7   :  { %v1240_v51 = vpop.trf.xlu1 }
 0x4e8   :  { %2236 = vmatmul.mubr.msk.f32.gmra.mrb[86].mxu1 %vm221_vm1, %v1240_v51  ;;  %v1272_v63 = vpop.trf.xlu0 }
 0x4e9   :  { %1494 = vmatprep.mubr.f32.mxu1 %v3772_v53 }
 0x4eb   :  { %v1241_v42 = vpop.trf.xlu1 }
 0x4ec   :  { %2237 = vmatmul.mubr.msk.f32.gmra.mrb[88].mxu1 %vm221_vm1, %v1241_v42  ;;  %v1273_v34 = vpop.trf.xlu0 }
 0x4ed   :  { %1500 = vmatprep.mubr.f32.mxu1 %v3772_v53 }
 0x4ef   :  { %v1242_v21 = vpop.trf.xlu1 }
 0x4f0   :  { %2238 = vmatmul.mubr.msk.f32.gmra.mrb[90].mxu1 %vm221_vm1, %v1242_v21  ;;  %v1274_v35 = vpop.trf.xlu0 }
 0x4f1   :  { %1506 = vmatprep.mubr.f32.mxu1 %v3772_v53 }
 0x4f3   :  { %v1243_v55 = vpop.trf.xlu1 }
 0x4f4   :  { %2239 = vmatmul.mubr.msk.f32.gmra.mrb[92].mxu1 %vm221_vm1, %v1243_v55  ;;  %v1275_v58 = vpop.trf.xlu0 }
 0x4f5   :  { %1512 = vmatprep.mubr.f32.mxu1 %v3772_v53 }
 0x4f7   :  { %v1244_v5 = vpop.trf.xlu1 }
 0x4f8   :  { %2240 = vmatmul.mubr.msk.f32.gmra.mrb[94].mxu1 %vm221_vm1, %v1244_v5  ;;  %v1276_v0 = vpop.trf.xlu0 }
 0x4f9   :  { %1518 = vmatprep.mubr.f32.mxu1 %v3772_v53 }
 0x4fb   :  { %v1245_v49 = vpop.trf.xlu1 }
 0x4fc   :  { %2241 = vmatmul.mubr.msk.f32.gmra.mrb[96].mxu1 %vm221_vm1, %v1245_v49  ;;  %v1277_v60 = vpop.trf.xlu0 }
 0x4fd   :  { %1524 = vmatprep.mubr.f32.mxu1 %v3772_v53 }
 0x4ff   :  { %v1246_v50 = vpop.trf.xlu1 }
 0x500   :  { %2242 = vmatmul.mubr.msk.f32.gmra.mrb[98].mxu1 %vm221_vm1, %v1246_v50  ;;  %v1278_v9 = vpop.trf.xlu0 }
 0x501   :  { %1530 = vmatprep.mubr.f32.mxu1 %v3772_v53 }
 0x503   :  { %v1247_v32 = vpop.trf.xlu1 }
 0x504   :  { %2243 = vmatmul.mubr.msk.f32.gmra.mrb[100].mxu1 %vm221_vm1, %v1247_v32  ;;  %v1279_v22 = vpop.trf.xlu0 }
 0x505   :  { %1536 = vmatprep.mubr.f32.mxu1 %v3772_v53 }
 0x508   :  { %2244 = vmatmul.mubr.msk.f32.gmra.mrb[102].mxu1 %vm221_vm1, %v1264_v15 }
 0x509   :  { %1542 = vmatprep.mubr.f32.mxu1 %v3772_v53 }
 0x50c   :  { %2245 = vmatmul.mubr.msk.f32.gmra.mrb[104].mxu1 %vm221_vm1, %v1265_v16 }
 0x50d   :  { %1548 = vmatprep.mubr.f32.mxu1 %v3772_v53 }
 0x510   :  { %2246 = vmatmul.mubr.msk.f32.gmra.mrb[106].mxu1 %vm221_vm1, %v1266_v56 }
 0x511   :  { %1554 = vmatprep.mubr.f32.mxu1 %v3772_v53 }
 0x514   :  { %2247 = vmatmul.mubr.msk.f32.gmra.mrb[108].mxu1 %vm221_vm1, %v1267_v39 }
 0x515   :  { %1560 = vmatprep.mubr.f32.mxu1 %v3772_v53 }
 0x518   :  { %2248 = vmatmul.mubr.msk.f32.gmra.mrb[110].mxu1 %vm221_vm1, %v1268_v31 }
 0x519   :  { %1566 = vmatprep.mubr.f32.mxu1 %v3772_v53 }
 0x51c   :  { %2249 = vmatmul.mubr.msk.f32.gmra.mrb[112].mxu1 %vm221_vm1, %v1269_v6 }
 0x51d   :  { %1572 = vmatprep.mubr.f32.mxu1 %v3772_v53 }
 0x520   :  { %2250 = vmatmul.mubr.msk.f32.gmra.mrb[114].mxu1 %vm221_vm1, %v1270_v52 }
 0x521   :  { %1578 = vmatprep.mubr.f32.mxu1 %v3772_v53 }
 0x524   :  { %2251 = vmatmul.mubr.msk.f32.gmra.mrb[116].mxu1 %vm221_vm1, %v1271_v17 }
 0x525   :  { %1584 = vmatprep.mubr.f32.mxu1 %v3772_v53 }
 0x528   :  { %2252 = vmatmul.mubr.msk.f32.gmra.mrb[118].mxu1 %vm221_vm1, %v1272_v63 }
 0x529   :  { %1590 = vmatprep.mubr.f32.mxu1 %v3772_v53 }
 0x52c   :  { %2253 = vmatmul.mubr.msk.f32.gmra.mrb[120].mxu1 %vm221_vm1, %v1273_v34  ;;  %v3366_v19 = vpop.f32.mrb[66].mxu1 }
 0x52d   :  { %3778 = vst [vmem:[#allocation13_spill] sm:$0xff] %v3366_v19  ;;  %1596 = vmatprep.mubr.f32.mxu1 %v3772_v53  ;;  %v3369_v20 = vpop.f32.mrb[67].mxu1 }
 0x52e   :  { %3779 = vst [vmem:[#allocation14_spill] sm:$0xff] %v3369_v20 }
 0x530   :  { %2254 = vmatmul.mubr.msk.f32.gmra.mrb[122].mxu1 %vm221_vm1, %v1274_v35  ;;  %v3372_v8 = vpop.f32.mrb[68].mxu1 }
 0x531   :  { %3780 = vst [vmem:[#allocation15_spill] sm:$0xff] %v3372_v8  ;;  %1602 = vmatprep.mubr.f32.mxu1 %v3772_v53  ;;  %v3375_v57 = vpop.f32.mrb[69].mxu1 }
 0x532   :  { %3781 = vst [vmem:[#allocation16_spill] sm:$0xff] %v3375_v57 }
 0x534   :  { %2255 = vmatmul.mubr.msk.f32.gmra.mrb[124].mxu1 %vm221_vm1, %v1275_v58 }
 0x535   :  { %1608 = vmatprep.mubr.f32.mxu1 %v3772_v53 }
 0x538   :  { %2256 = vmatmul.mubr.msk.f32.gmra.mrb[126].mxu1 %vm221_vm1, %v1276_v0 }
 0x539   :  { %1614 = vmatprep.mubr.f32.mxu1 %v3772_v53 }
 0x53c   :  { %2257 = vmatmul.mubr.msk.f32.gmra.mrb[128].mxu1 %vm221_vm1, %v1277_v60 }
 0x53d   :  { %1620 = vmatprep.mubr.f32.mxu1 %v3772_v53 }
 0x540   :  { %2258 = vmatmul.mubr.msk.f32.gmra.mrb[130].mxu1 %vm221_vm1, %v1278_v9 }
 0x541   :  { %1626 = vmatprep.mubr.f32.mxu1 %v3772_v53 }
 0x544   :  { %2259 = vmatmul.mubr.msk.f32.gmra.mrb[132].mxu1 %vm221_vm1, %v1279_v22 }
 0x545   :  { %2056 = vmatprep.mubr.f32.mxu1 %v3721_v1 }
 0x59b   :  { %v3387_v23 = vpop.f32.mrb[70].mxu1 }
 0x59c   :  { %v3389_v4 = vpop.f32.mrb[71].mxu1 }
 0x59d   :  { %v1633_v7 = vmax.f32 %v3387_v23, %v3389_v4 }
 0x59f   :  { %1634 = vmax.xlane.f32.xlu0 %v1633_v7  ;;  %v3393_v12 = vpop.f32.mrb[72].mxu1 }
 0x5a0   :  { %v3395_v37 = vpop.f32.mrb[73].mxu1 }
 0x5a1   :  { %v1636_v38 = vmax.f32 %v3393_v12, %v3395_v37 }
 0x5a3   :  { %1637 = vmax.xlane.f32.xlu1 %v1636_v38  ;;  %v3399_v45 = vpop.f32.mrb[74].mxu1 }
 0x5a4   :  { %v3401_v54 = vpop.f32.mrb[75].mxu1 }
 0x5a5   :  { %v1639_v40 = vmax.f32 %v3399_v45, %v3401_v54 }
 0x5a7   :  { %1640 = vmax.xlane.f32.xlu1 %v1639_v40  ;;  %v3405_v61 = vpop.f32.mrb[76].mxu1 }
 0x5a8   :  { %v3407_v14 = vpop.f32.mrb[77].mxu1 }
 0x5a9   :  { %v1642_v18 = vmax.f32 %v3405_v61, %v3407_v14 }
 0x5ab   :  { %1643 = vmax.xlane.f32.xlu0 %v1642_v18  ;;  %v3411_v62 = vpop.f32.mrb[78].mxu1 }
 0x5ac   :  { %v3413_v30 = vpop.f32.mrb[79].mxu1 }
 0x5ad   :  { %v1645_v2 = vmax.f32 %v3411_v62, %v3413_v30 }
 0x5af   :  { %1646 = vmax.xlane.f32.xlu1 %v1645_v2  ;;  %v3417_v24 = vpop.f32.mrb[80].mxu1 }
 0x5b0   :  { %v3419_v27 = vpop.f32.mrb[81].mxu1 }
 0x5b1   :  { %v1648_v48 = vmax.f32 %v3417_v24, %v3419_v27 }
 0x5b3   :  { %1649 = vmax.xlane.f32.xlu0 %v1648_v48  ;;  %v3423_v25 = vpop.f32.mrb[82].mxu1 }
 0x5b4   :  { %v3425_v26 = vpop.f32.mrb[83].mxu1 }
 0x5b5   :  { %v1651_v11 = vmax.f32 %v3423_v25, %v3425_v26 }
 0x5b7   :  { %1652 = vmax.xlane.f32.xlu1 %v1651_v11  ;;  %v3429_v13 = vpop.f32.mrb[84].mxu1 }
 0x5b8   :  { %v3431_v43 = vpop.f32.mrb[85].mxu1 }
 0x5b9   :  { %v1654_v44 = vmax.f32 %v3429_v13, %v3431_v43 }
 0x5bb   :  { %1655 = vmax.xlane.f32.xlu0 %v1654_v44  ;;  %v3435_v3 = vpop.f32.mrb[86].mxu1 }
 0x5bc   :  { %v3437_v28 = vpop.f32.mrb[87].mxu1 }
 0x5bd   :  { %v1657_v29 = vmax.f32 %v3435_v3, %v3437_v28 }
 0x5bf   :  { %1658 = vmax.xlane.f32.xlu1 %v1657_v29  ;;  %v3441_v33 = vpop.f32.mrb[88].mxu1 }
 0x5c0   :  { %v3443_v46 = vpop.f32.mrb[89].mxu1 }
 0x5c1   :  { %v1660_v47 = vmax.f32 %v3441_v33, %v3443_v46 }
 0x5c3   :  { %1661 = vmax.xlane.f32.xlu0 %v1660_v47  ;;  %v3447_v10 = vpop.f32.mrb[90].mxu1 }
 0x5c4   :  { %v3449_v51 = vpop.f32.mrb[91].mxu1 }
 0x5c5   :  { %v1663_v15 = vmax.f32 %v3447_v10, %v3449_v51 }
 0x5c7   :  { %1664 = vmax.xlane.f32.xlu1 %v1663_v15  ;;  %v3453_v42 = vpop.f32.mrb[92].mxu1 }
 0x5c8   :  { %v3455_v16 = vpop.f32.mrb[93].mxu1 }
 0x5c9   :  { %v1666_v21 = vmax.f32 %v3453_v42, %v3455_v16 }
 0x5cb   :  { %1667 = vmax.xlane.f32.xlu0 %v1666_v21  ;;  %v3459_v55 = vpop.f32.mrb[94].mxu1 }
 0x5cc   :  { %v3461_v56 = vpop.f32.mrb[95].mxu1 }
 0x5cd   :  { %v1669_v5 = vmax.f32 %v3459_v55, %v3461_v56 }
 0x5cf   :  { %1670 = vmax.xlane.f32.xlu1 %v1669_v5  ;;  %v3465_v39 = vpop.f32.mrb[96].mxu1 }
 0x5d0   :  { %v3467_v49 = vpop.f32.mrb[97].mxu1 }
 0x5d1   :  { %v1672_v50 = vmax.f32 %v3465_v39, %v3467_v49 }
 0x5d3   :  { %1673 = vmax.xlane.f32.xlu0 %v1672_v50  ;;  %v3471_v31 = vpop.f32.mrb[98].mxu1 }
 0x5d4   :  { %v3473_v32 = vpop.f32.mrb[99].mxu1 }
 0x5d5   :  { %v1675_v6 = vmax.f32 %v3471_v31, %v3473_v32 }
 0x5d7   :  { %1676 = vmax.xlane.f32.xlu1 %v1675_v6  ;;  %v3477_v52 = vpop.f32.mrb[100].mxu1 }
 0x5d8   :  { %v3479_v17 = vpop.f32.mrb[101].mxu1 }
 0x5d9   :  { %v1678_v63 = vmax.f32 %v3477_v52, %v3479_v17 }
 0x5db   :  { %1679 = vmax.xlane.f32.xlu0 %v1678_v63  ;;  %v3483_v34 = vpop.f32.mrb[102].mxu1 }
 0x5dc   :  { %v3485_v35 = vpop.f32.mrb[103].mxu1 }
 0x5dd   :  { %v1681_v58 = vmax.f32 %v3483_v34, %v3485_v35 }
 0x5df   :  { %1682 = vmax.xlane.f32.xlu1 %v1681_v58  ;;  %v3489_v0 = vpop.f32.mrb[104].mxu1 }
 0x5e0   :  { %v3491_v60 = vpop.f32.mrb[105].mxu1 }
 0x5e1   :  { %v1684_v9 = vmax.f32 %v3489_v0, %v3491_v60 }
 0x5e3   :  { %1685 = vmax.xlane.f32.xlu0 %v1684_v9  ;;  %v3495_v22 = vpop.f32.mrb[106].mxu1 }
 0x5e4   :  { %v3497_v7 = vpop.f32.mrb[107].mxu1 }
 0x5e5   :  { %v1687_v38 = vmax.f32 %v3495_v22, %v3497_v7 }
 0x5e7   :  { %1688 = vmax.xlane.f32.xlu1 %v1687_v38  ;;  %v3501_v40 = vpop.f32.mrb[108].mxu1 }
 0x5e8   :  { %v3503_v18 = vpop.f32.mrb[109].mxu1 }
 0x5e9   :  { %v1690_v2 = vmax.f32 %v3501_v40, %v3503_v18 }
 0x5eb   :  { %1691 = vmax.xlane.f32.xlu0 %v1690_v2  ;;  %v3507_v48 = vpop.f32.mrb[110].mxu1 }
 0x5ec   :  { %v3509_v11 = vpop.f32.mrb[111].mxu1 }
 0x5ed   :  { %v1693_v44 = vmax.f32 %v3507_v48, %v3509_v11 }
 0x5ef   :  { %1694 = vmax.xlane.f32.xlu1 %v1693_v44  ;;  %v3513_v29 = vpop.f32.mrb[112].mxu1 }
 0x5f0   :  { %v3515_v47 = vpop.f32.mrb[113].mxu1 }
 0x5f1   :  { %v1696_v15 = vmax.f32 %v3513_v29, %v3515_v47 }
 0x5f3   :  { %1697 = vmax.xlane.f32.xlu0 %v1696_v15  ;;  %v3519_v21 = vpop.f32.mrb[114].mxu1 }
 0x5f4   :  { %v3521_v5 = vpop.f32.mrb[115].mxu1 }
 0x5f5   :  { %v1699_v50 = vmax.f32 %v3519_v21, %v3521_v5 }
 0x5f7   :  { %1700 = vmax.xlane.f32.xlu1 %v1699_v50  ;;  %v3525_v6 = vpop.f32.mrb[116].mxu1 }
 0x5f8   :  { %v3527_v63 = vpop.f32.mrb[117].mxu1 }
 0x5f9   :  { %v1702_v58 = vmax.f32 %v3525_v6, %v3527_v63 }
 0x5fb   :  { %1703 = vmax.xlane.f32.xlu0 %v1702_v58  ;;  %v3531_v9 = vpop.f32.mrb[118].mxu1 }
 0x5fc   :  { %v3533_v38 = vpop.f32.mrb[119].mxu1 }
 0x5fd   :  { %v1705_v2 = vmax.f32 %v3531_v9, %v3533_v38 }
 0x5ff   :  { %1706 = vmax.xlane.f32.xlu1 %v1705_v2  ;;  %v3537_v44 = vpop.f32.mrb[120].mxu1 }
 0x600   :  { %v3539_v15 = vpop.f32.mrb[121].mxu1 }
 0x601   :  { %3782 = vst [vmem:[#allocation17_spill] sm:$0xff] %v3539_v15  ;;  %v1708_v50 = vmax.f32 %v3537_v44, %v3539_v15 }
 0x603   :  { %1709 = vmax.xlane.f32.xlu0 %v1708_v50  ;;  %v3543_v1 = vpop.f32.mrb[122].mxu1 }
 0x604   :  { %3783 = vst [vmem:[#allocation18_spill] sm:$0xff] %v3543_v1  ;;  %v3545_v41 = vpop.f32.mrb[123].mxu1 }
 0x605   :  { %3784 = vst [vmem:[#allocation19_spill] sm:$0xff] %v3545_v41  ;;  %v1711_v58 = vmax.f32 %v3543_v1, %v3545_v41 }
 0x607   :  { %1712 = vmax.xlane.f32.xlu1 %v1711_v58  ;;  %v3549_v53 = vpop.f32.mrb[124].mxu1 }
 0x608   :  { %3785 = vst [vmem:[#allocation20_spill] sm:$0xff] %v3549_v53  ;;  %v3551_v59 = vpop.f32.mrb[125].mxu1 }
 0x609   :  { %3786 = vst [vmem:[#allocation21_spill] sm:$0xff] %v3551_v59  ;;  %v1714_v2 = vmax.f32 %v3549_v53, %v3551_v59 }
 0x60b   :  { %1715 = vmax.xlane.f32.xlu0 %v1714_v2  ;;  %v3555_v36 = vpop.f32.mrb[126].mxu1 }
 0x60c   :  { %3787 = vst [vmem:[#allocation22_spill] sm:$0xff] %v3555_v36  ;;  %v3557_v57 = vpop.f32.mrb[127].mxu1 }
 0x60d   :  { %3788 = vst [vmem:[#allocation24_spill] sm:$0xff] %v3557_v57  ;;  %v1717_v50 = vmax.f32 %v3555_v36, %v3557_v57 }
 0x60f   :  { %1718 = vmax.xlane.f32.xlu1 %v1717_v50  ;;  %v3561_v8 = vpop.f32.mrb[128].mxu1 }
 0x610   :  { %3789 = vst [vmem:[#allocation23_spill] sm:$0xff] %v3561_v8  ;;  %v3563_v20 = vpop.f32.mrb[129].mxu1 }
 0x611   :  { %3790 = vst [vmem:[#allocation8_spill] sm:$0xff] %v3563_v20  ;;  %v1720_v58 = vmax.f32 %v3561_v8, %v3563_v20 }
 0x613   :  { %1721 = vmax.xlane.f32.xlu0 %v1720_v58  ;;  %v3567_v19 = vpop.f32.mrb[130].mxu1  ;;  %v43_v58 = vld [vmem:[%s3699_s4] sm:$0xff] }
 0x614   :  { %3791 = vst [vmem:[#allocation9_spill] sm:$0xff] %v3567_v19  ;;  %v3569_v59 = vpop.f32.mrb[131].mxu1 }
 0x615   :  { %3792 = vst [vmem:[#allocation25_spill] sm:$0xff] %v3569_v59  ;;  %v1723_v2 = vmax.f32 %v3567_v19, %v3569_v59 }
 0x617   :  { %1724 = vmax.xlane.f32.xlu1 %v1723_v2  ;;  %v3573_v53 = vpop.f32.mrb[132].mxu1  ;;  %v44_v2 = vld [vmem:[%s3699_s4 + $0x8] sm:$0xff] }
 0x618   :  { %3793 = vst [vmem:[#allocation26_spill] sm:$0xff] %v3573_v53  ;;  %v3575_v57 = vpop.f32.mrb[133].mxu1 }
 0x619   :  { %3794 = vst [vmem:[#allocation27_spill] sm:$0xff] %v3575_v57  ;;  %v1726_v50 = vmax.f32 %v3573_v53, %v3575_v57 }
 0x61b   :  { %1727 = vmax.xlane.f32.xlu0 %v1726_v50 }
 0x628   :  { %1112 = vperm.xlu1 %2534, %v43_v58  }
 0x62c   :  { %v1635_v20 = vpop.xlane.xlu0 %1634 }
 0x62d   :  { %v1729_v8 = vsub.f32 %v3387_v23, %v1635_v20  ;;  %v1730_v36 = vsub.f32 %v3389_v4, %v1635_v20 }
 0x62f   :  { %v1793_v59 = vmul.f32 1.442695, %v1729_v8  ;;  %v1795_v19 = vmul.f32 1.442695, %v1730_v36 }
 0x630   :  { %v1638_v41 = vpop.xlane.xlu1 %1637 }
 0x631   :  { %v1731_v57 = vsub.f32 %v3393_v12, %v1638_v41  ;;  %v1732_v50 = vsub.f32 %v3395_v37, %v1638_v41  ;;  %1117 = vperm.xlu0 %2533, %v44_v2   ;;  %2667 = vpow2.f32 %v1793_v59 }
 0x632   :  { %2669 = vpow2.f32 %v1795_v19 }
 0x633   :  { %v1797_v53 = vmul.f32 1.442695, %v1731_v57  ;;  %v1799_v58 = vmul.f32 1.442695, %v1732_v50 }
 0x634   :  { %v1641_v1 = vpop.xlane.xlu1 %1640 }
 0x635   :  { %2671 = vpow2.f32 %v1797_v53  ;;  %v1733_v20 = vsub.f32 %v3399_v45, %v1641_v1  ;;  %v1734_v23 = vsub.f32 %v3401_v54, %v1641_v1 }
 0x636   :  { %2673 = vpow2.f32 %v1799_v58 }
 0x637   :  { %v1801_v4 = vmul.f32 1.442695, %v1733_v20  ;;  %v1803_v8 = vmul.f32 1.442695, %v1734_v23 }
 0x638   :  { %v1644_v36 = vpop.xlane.xlu0 %1643 }
 0x639   :  { %v1735_v15 = vsub.f32 %v3405_v61, %v1644_v36  ;;  %v1736_v12 = vsub.f32 %v3407_v14, %v1644_v36  ;;  %2675 = vpow2.f32 %v1801_v4 }
 0x63a   :  { %2677 = vpow2.f32 %v1803_v8 }
 0x63b   :  { %v1805_v41 = vmul.f32 1.442695, %v1735_v15  ;;  %v1807_v59 = vmul.f32 1.442695, %v1736_v12  ;;  %v2668_v19 = vpop.eup %2667 }
 0x63c   :  { %v1647_v57 = vpop.xlane.xlu1 %1646  ;;  %v2670_v1 = vpop.eup %2669 }
 0x63d   :  { %2679 = vpow2.f32 %v1805_v41  ;;  %v1737_v53 = vsub.f32 %v3411_v62, %v1647_v57  ;;  %v1738_v37 = vsub.f32 %v3413_v30, %v1647_v57 }
 0x63e   :  { %2681 = vpow2.f32 %v1807_v59 }
 0x63f   :  { %v2672_v45 = vpop.eup %2671  ;;  %v1809_v54 = vmul.f32 1.442695, %v1737_v53  ;;  %v1811_v50 = vmul.f32 1.442695, %v1738_v37 }
 0x640   :  { %v2674_v2 = vpop.eup %2673  ;;  %v1650_v61 = vpop.xlane.xlu0 %1649  ;;  %v2400_v58 = vpack.c.bf16 %v2672_v45, %v2668_v19 }
 0x641   :  { %v1739_v14 = vsub.f32 %v3417_v24, %v1650_v61  ;;  %v1740_v15 = vsub.f32 %v3419_v27, %v1650_v61  ;;  %v2398_v20 = vpack.c.bf16 %v2674_v2, %v2670_v1  ;;  %2683 = vpow2.f32 %v1809_v54 }
 0x642   :  { %2685 = vpow2.f32 %v1811_v50 }
 0x643   :  { %v1813_v23 = vmul.f32 1.442695, %v1739_v14  ;;  %v1815_v4 = vmul.f32 1.442695, %v1740_v15  ;;  %2399 = vmatprep.subr.bf16.mxu0 %v2398_v20  ;;  %2463 = vmatprep.subr.bf16.mxu1 %v2398_v20  ;;  %v2676_v30 = vpop.eup %2675 }
 0x644   :  { %2401 = vmatpush1.bf16.xpose.msra.mxu0 %v2400_v58  ;;  %2465 = vmatpush1.bf16.xpose.msra.mxu1 %v2400_v58  ;;  %v1653_v62 = vpop.xlane.xlu1 %1652  ;;  %v2678_v12 = vpop.eup %2677 }
 0x645   :  { %2687 = vpow2.f32 %v1813_v23  ;;  %v1741_v8 = vsub.f32 %v3423_v25, %v1653_v62  ;;  %v1742_v36 = vsub.f32 %v3425_v26, %v1653_v62 }
 0x646   :  { %2689 = vpow2.f32 %v1815_v4 }
 0x647   :  { %v2680_v24 = vpop.eup %2679  ;;  %v1817_v27 = vmul.f32 1.442695, %v1741_v8  ;;  %v1819_v59 = vmul.f32 1.442695, %v1742_v36 }
 0x648   :  { %v2682_v41 = vpop.eup %2681  ;;  %v1656_v57 = vpop.xlane.xlu0 %1655  ;;  %v2404_v19 = vpack.c.bf16 %v2680_v24, %v2676_v30 }
 0x649   :  { %v1743_v53 = vsub.f32 %v3429_v13, %v1656_v57  ;;  %v1744_v37 = vsub.f32 %v3431_v43, %v1656_v57  ;;  %v2402_v1 = vpack.c.bf16 %v2682_v41, %v2678_v12  ;;  %2691 = vpow2.f32 %v1817_v27 }
 0x64a   :  { %2693 = vpow2.f32 %v1819_v59 }
 0x64b   :  { %v1821_v45 = vmul.f32 1.442695, %v1743_v53  ;;  %v1823_v54 = vmul.f32 1.442695, %v1744_v37  ;;  %2403 = vmatprep.subr.bf16.mxu0 %v2402_v1  ;;  %2467 = vmatprep.subr.bf16.mxu1 %v2402_v1  ;;  %v2684_v26 = vpop.eup %2683 }
 0x64c   :  { %2405 = vmatpush1.bf16.xpose.msra.mxu0 %v2404_v19  ;;  %2469 = vmatpush1.bf16.xpose.msra.mxu1 %v2404_v19  ;;  %v1659_v25 = vpop.xlane.xlu1 %1658  ;;  %v2686_v61 = vpop.eup %2685 }
 0x64d   :  { %2695 = vpow2.f32 %v1821_v45  ;;  %v1745_v2 = vsub.f32 %v3435_v3, %v1659_v25  ;;  %v1746_v50 = vsub.f32 %v3437_v28, %v1659_v25 }
 0x64e   :  { %2697 = vpow2.f32 %v1823_v54 }
 0x64f   :  { %v2688_v13 = vpop.eup %2687  ;;  %v1825_v43 = vmul.f32 1.442695, %v1745_v2  ;;  %v1827_v14 = vmul.f32 1.442695, %v1746_v50 }
 0x650   :  { %v2690_v58 = vpop.eup %2689  ;;  %v1662_v15 = vpop.xlane.xlu0 %1661  ;;  %v2408_v20 = vpack.c.bf16 %v2688_v13, %v2684_v26 }
 0x651   :  { %v1747_v23 = vsub.f32 %v3441_v33, %v1662_v15  ;;  %v1748_v4 = vsub.f32 %v3443_v46, %v1662_v15  ;;  %v2406_v62 = vpack.c.bf16 %v2690_v58, %v2686_v61  ;;  %2699 = vpow2.f32 %v1825_v43 }
 0x652   :  { %2701 = vpow2.f32 %v1827_v14 }
 0x653   :  { %v1829_v30 = vmul.f32 1.442695, %v1747_v23  ;;  %v1831_v8 = vmul.f32 1.442695, %v1748_v4  ;;  %2407 = vmatprep.subr.bf16.mxu0 %v2406_v62  ;;  %2471 = vmatprep.subr.bf16.mxu1 %v2406_v62  ;;  %v2692_v28 = vpop.eup %2691 }
 0x654   :  { %2409 = vmatpush1.bf16.xpose.msra.mxu0 %v2408_v20  ;;  %2473 = vmatpush1.bf16.xpose.msra.mxu1 %v2408_v20  ;;  %v1665_v3 = vpop.xlane.xlu1 %1664  ;;  %v2694_v24 = vpop.eup %2693 }
 0x655   :  { %2703 = vpow2.f32 %v1829_v30  ;;  %v1749_v36 = vsub.f32 %v3447_v10, %v1665_v3  ;;  %v1750_v12 = vsub.f32 %v3449_v51, %v1665_v3 }
 0x656   :  { %2705 = vpow2.f32 %v1831_v8 }
 0x657   :  { %v2696_v33 = vpop.eup %2695  ;;  %v1833_v46 = vmul.f32 1.442695, %v1749_v36  ;;  %v1835_v41 = vmul.f32 1.442695, %v1750_v12 }
 0x658   :  { %v2698_v27 = vpop.eup %2697  ;;  %v1668_v59 = vpop.xlane.xlu0 %1667  ;;  %v2412_v57 = vpack.c.bf16 %v2696_v33, %v2692_v28 }
 0x659   :  { %v1751_v19 = vsub.f32 %v3453_v42, %v1668_v59  ;;  %v1752_v53 = vsub.f32 %v3455_v16, %v1668_v59  ;;  %v2410_v37 = vpack.c.bf16 %v2698_v27, %v2694_v24  ;;  %2707 = vpow2.f32 %v1833_v46 }
 0x65a   :  { %2709 = vpow2.f32 %v1835_v41 }
 0x65b   :  { %v1837_v1 = vmul.f32 1.442695, %v1751_v19  ;;  %v1839_v45 = vmul.f32 1.442695, %v1752_v53  ;;  %2411 = vmatprep.subr.bf16.mxu0 %v2410_v37  ;;  %2475 = vmatprep.subr.bf16.mxu1 %v2410_v37  ;;  %v2700_v51 = vpop.eup %2699 }
 0x65c   :  { %2413 = vmatpush1.bf16.xpose.msra.mxu0 %v2412_v57  ;;  %2477 = vmatpush1.bf16.xpose.msra.mxu1 %v2412_v57  ;;  %v1671_v10 = vpop.xlane.xlu1 %1670  ;;  %v2702_v26 = vpop.eup %2701 }
 0x65d   :  { %2711 = vpow2.f32 %v1837_v1  ;;  %v1753_v54 = vsub.f32 %v3459_v55, %v1671_v10  ;;  %v1754_v25 = vsub.f32 %v3461_v56, %v1671_v10 }
 0x65e   :  { %2713 = vpow2.f32 %v1839_v45 }
 0x65f   :  { %v2704_v42 = vpop.eup %2703  ;;  %v1841_v16 = vmul.f32 1.442695, %v1753_v54  ;;  %v1843_v50 = vmul.f32 1.442695, %v1754_v25 }
 0x660   :  { %v2706_v2 = vpop.eup %2705  ;;  %v1674_v61 = vpop.xlane.xlu0 %1673  ;;  %v2416_v13 = vpack.c.bf16 %v2704_v42, %v2700_v51 }
 0x661   :  { %v1755_v43 = vsub.f32 %v3465_v39, %v1674_v61  ;;  %v1756_v58 = vsub.f32 %v3467_v49, %v1674_v61  ;;  %v2414_v14 = vpack.c.bf16 %v2706_v2, %v2702_v26  ;;  %2715 = vpow2.f32 %v1841_v16 }
 0x662   :  { %2717 = vpow2.f32 %v1843_v50 }
 0x663   :  { %v1845_v15 = vmul.f32 1.442695, %v1755_v43  ;;  %v1847_v20 = vmul.f32 1.442695, %v1756_v58  ;;  %2415 = vmatprep.subr.bf16.mxu0 %v2414_v14  ;;  %2479 = vmatprep.subr.bf16.mxu1 %v2414_v14  ;;  %v2708_v56 = vpop.eup %2707 }
 0x664   :  { %2417 = vmatpush1.bf16.xpose.msra.mxu0 %v2416_v13  ;;  %2481 = vmatpush1.bf16.xpose.msra.mxu1 %v2416_v13  ;;  %v1677_v55 = vpop.xlane.xlu1 %1676  ;;  %v2710_v62 = vpop.eup %2709 }
 0x665   :  { %2719 = vpow2.f32 %v1845_v15  ;;  %v1757_v23 = vsub.f32 %v3471_v31, %v1677_v55  ;;  %v1758_v4 = vsub.f32 %v3473_v32, %v1677_v55 }
 0x666   :  { %2721 = vpow2.f32 %v1847_v20 }
 0x667   :  { %v2712_v39 = vpop.eup %2711  ;;  %v1849_v49 = vmul.f32 1.442695, %v1757_v23  ;;  %v1851_v8 = vmul.f32 1.442695, %v1758_v4 }
 0x668   :  { %v2714_v30 = vpop.eup %2713  ;;  %v1680_v3 = vpop.xlane.xlu0 %1679  ;;  %v2420_v28 = vpack.c.bf16 %v2712_v39, %v2708_v56 }
 0x669   :  { %v1759_v36 = vsub.f32 %v3477_v52, %v1680_v3  ;;  %v1760_v12 = vsub.f32 %v3479_v17, %v1680_v3  ;;  %v2418_v24 = vpack.c.bf16 %v2714_v30, %v2710_v62  ;;  %2723 = vpow2.f32 %v1849_v49 }
 0x66a   :  { %2725 = vpow2.f32 %v1851_v8 }
 0x66b   :  { %v1853_v33 = vmul.f32 1.442695, %v1759_v36  ;;  %v1855_v46 = vmul.f32 1.442695, %v1760_v12  ;;  %2419 = vmatprep.subr.bf16.mxu0 %v2418_v24  ;;  %2483 = vmatprep.subr.bf16.mxu1 %v2418_v24  ;;  %v2716_v32 = vpop.eup %2715 }
 0x66c   :  { %2421 = vmatpush1.bf16.xpose.msra.mxu0 %v2420_v28  ;;  %2485 = vmatpush1.bf16.xpose.msra.mxu1 %v2420_v28  ;;  %v1683_v31 = vpop.xlane.xlu1 %1682  ;;  %v2718_v59 = vpop.eup %2717 }
 0x66d   :  { %2727 = vpow2.f32 %v1853_v33  ;;  %v1761_v27 = vsub.f32 %v3483_v34, %v1683_v31  ;;  %v1762_v41 = vsub.f32 %v3485_v35, %v1683_v31 }
 0x66e   :  { %2729 = vpow2.f32 %v1855_v46 }
 0x66f   :  { %v2720_v52 = vpop.eup %2719  ;;  %v1857_v17 = vmul.f32 1.442695, %v1761_v27  ;;  %v1859_v19 = vmul.f32 1.442695, %v1762_v41 }
 0x670   :  { %v2722_v57 = vpop.eup %2721  ;;  %v1686_v53 = vpop.xlane.xlu0 %1685  ;;  %v2424_v37 = vpack.c.bf16 %v2720_v52, %v2716_v32 }
 0x671   :  { %v1763_v1 = vsub.f32 %v3489_v0, %v1686_v53  ;;  %v1764_v45 = vsub.f32 %v3491_v60, %v1686_v53  ;;  %v2422_v10 = vpack.c.bf16 %v2722_v57, %v2718_v59  ;;  %2731 = vpow2.f32 %v1857_v17 }
 0x672   :  { %2733 = vpow2.f32 %v1859_v19 }
 0x673   :  { %v1861_v51 = vmul.f32 1.442695, %v1763_v1  ;;  %v1863_v54 = vmul.f32 1.442695, %v1764_v45  ;;  %2423 = vmatprep.subr.bf16.mxu0 %v2422_v10  ;;  %2487 = vmatprep.subr.bf16.mxu1 %v2422_v10  ;;  %v2724_v35 = vpop.eup %2723 }
 0x674   :  { %2425 = vmatpush1.bf16.xpose.msra.mxu0 %v2424_v37  ;;  %2489 = vmatpush1.bf16.xpose.msra.mxu1 %v2424_v37  ;;  %v1689_v34 = vpop.xlane.xlu1 %1688  ;;  %v2726_v42 = vpop.eup %2725 }
 0x675   :  { %2735 = vpow2.f32 %v1861_v51  ;;  %v1765_v25 = vsub.f32 %v3495_v22, %v1689_v34  ;;  %v1766_v26 = vsub.f32 %v3497_v7, %v1689_v34 }
 0x676   :  { %2737 = vpow2.f32 %v1863_v54  ;;  %v3795_v54 = vld [vmem:[#allocation17_spill] sm:$0xff] }
 0x677   :  { %v2728_v0 = vpop.eup %2727  ;;  %v1865_v60 = vmul.f32 1.442695, %v1765_v25  ;;  %v1867_v2 = vmul.f32 1.442695, %v1766_v26 }
 0x678   :  { %v2730_v16 = vpop.eup %2729  ;;  %v1692_v50 = vpop.xlane.xlu0 %1691  ;;  %v2428_v61 = vpack.c.bf16 %v2728_v0, %v2724_v35 }
 0x679   :  { %v1767_v13 = vsub.f32 %v3501_v40, %v1692_v50  ;;  %v1768_v43 = vsub.f32 %v3503_v18, %v1692_v50  ;;  %v2426_v58 = vpack.c.bf16 %v2730_v16, %v2726_v42  ;;  %2739 = vpow2.f32 %v1865_v60  ;;  %v3796_v42 = vld [vmem:[#allocation18_spill] sm:$0xff] }
 0x67a   :  { %2741 = vpow2.f32 %v1867_v2 }
 0x67b   :  { %v1869_v14 = vmul.f32 1.442695, %v1767_v13  ;;  %v1871_v15 = vmul.f32 1.442695, %v1768_v43  ;;  %2427 = vmatprep.subr.bf16.mxu0 %v2426_v58  ;;  %2491 = vmatprep.subr.bf16.mxu1 %v2426_v58  ;;  %v2732_v7 = vpop.eup %2731  ;;  %v3798_v58 = vld [vmem:[#allocation20_spill] sm:$0xff] }
 0x67c   :  { %2429 = vmatpush1.bf16.xpose.msra.mxu0 %v2428_v61  ;;  %2493 = vmatpush1.bf16.xpose.msra.mxu1 %v2428_v61  ;;  %v1695_v22 = vpop.xlane.xlu1 %1694  ;;  %v2734_v56 = vpop.eup %2733 }
 0x67d   :  { %2743 = vpow2.f32 %v1869_v14  ;;  %v1769_v20 = vsub.f32 %v3507_v48, %v1695_v22  ;;  %v1770_v55 = vsub.f32 %v3509_v11, %v1695_v22 }
 0x67e   :  { %2745 = vpow2.f32 %v1871_v15  ;;  %v3799_v15 = vld [vmem:[#allocation21_spill] sm:$0xff] }
 0x67f   :  { %v2736_v40 = vpop.eup %2735  ;;  %v1873_v18 = vmul.f32 1.442695, %v1769_v20  ;;  %v1875_v4 = vmul.f32 1.442695, %v1770_v55 }
 0x680   :  { %v2738_v23 = vpop.eup %2737  ;;  %v1698_v62 = vpop.xlane.xlu0 %1697  ;;  %v2432_v39 = vpack.c.bf16 %v2736_v40, %v2732_v7 }
 0x681   :  { %v1771_v49 = vsub.f32 %v3513_v29, %v1698_v62  ;;  %v1772_v30 = vsub.f32 %v3515_v47, %v1698_v62  ;;  %v2430_v8 = vpack.c.bf16 %v2738_v23, %v2734_v56  ;;  %2747 = vpow2.f32 %v1873_v18  ;;  %v3800_v23 = vld [vmem:[#allocation22_spill] sm:$0xff]  ;;  %v3801_v62 = vld [vmem:[#allocation24_spill] sm:$0xff] }
 0x682   :  { %2749 = vpow2.f32 %v1875_v4 }
 0x683   :  { %v1877_v3 = vmul.f32 1.442695, %v1771_v49  ;;  %v1879_v28 = vmul.f32 1.442695, %v1772_v30  ;;  %2431 = vmatprep.subr.bf16.mxu0 %v2430_v8  ;;  %2495 = vmatprep.subr.bf16.mxu1 %v2430_v8  ;;  %v2740_v11 = vpop.eup %2739 }
 0x684   :  { %2433 = vmatpush1.bf16.xpose.msra.mxu0 %v2432_v39  ;;  %2497 = vmatpush1.bf16.xpose.msra.mxu1 %v2432_v39  ;;  %v1701_v48 = vpop.xlane.xlu1 %1700  ;;  %v2742_v24 = vpop.eup %2741 }
 0x685   :  { %2751 = vpow2.f32 %v1877_v3  ;;  %v1773_v36 = vsub.f32 %v3519_v21, %v1701_v48  ;;  %v1774_v12 = vsub.f32 %v3521_v5, %v1701_v48 }
 0x686   :  { %2753 = vpow2.f32 %v1879_v28 }
 0x687   :  { %v2744_v29 = vpop.eup %2743  ;;  %v1881_v47 = vmul.f32 1.442695, %v1773_v36  ;;  %v1883_v46 = vmul.f32 1.442695, %v1774_v12  ;;  %v3802_v36 = vld [vmem:[#allocation23_spill] sm:$0xff] }
 0x688   :  { %v2746_v33 = vpop.eup %2745  ;;  %v1704_v31 = vpop.xlane.xlu0 %1703  ;;  %v2436_v32 = vpack.c.bf16 %v2744_v29, %v2740_v11 }
 0x689   :  { %v1775_v27 = vsub.f32 %v3525_v6, %v1704_v31  ;;  %v1776_v41 = vsub.f32 %v3527_v63, %v1704_v31  ;;  %v2434_v59 = vpack.c.bf16 %v2746_v33, %v2742_v24  ;;  %2755 = vpow2.f32 %v1881_v47  ;;  %v3803_v24 = vld [vmem:[#allocation8_spill] sm:$0xff] }
 0x68a   :  { %2757 = vpow2.f32 %v1883_v46 }
 0x68b   :  { %v1885_v52 = vmul.f32 1.442695, %v1775_v27  ;;  %v1887_v17 = vmul.f32 1.442695, %v1776_v41  ;;  %2435 = vmatprep.subr.bf16.mxu0 %v2434_v59  ;;  %2499 = vmatprep.subr.bf16.mxu1 %v2434_v59  ;;  %v2748_v5 = vpop.eup %2747  ;;  %v3805_v41 = vld [vmem:[#allocation25_spill] sm:$0xff] }
 0x68c   :  { %2437 = vmatpush1.bf16.xpose.msra.mxu0 %v2436_v32  ;;  %2501 = vmatpush1.bf16.xpose.msra.mxu1 %v2436_v32  ;;  %v1707_v21 = vpop.xlane.xlu1 %1706  ;;  %v2750_v53 = vpop.eup %2749  ;;  %v3804_v32 = vld [vmem:[#allocation9_spill] sm:$0xff] }
 0x68d   :  { %2759 = vpow2.f32 %v1885_v52  ;;  %v1777_v57 = vsub.f32 %v3531_v9, %v1707_v21  ;;  %v1778_v19 = vsub.f32 %v3533_v38, %v1707_v21  ;;  %v2802_v21 = vld [vmem:[#allocation2] sm:$0xff] }
 0x68e   :  { %2761 = vpow2.f32 %v1887_v17 }
 0x68f   :  { %v2752_v6 = vpop.eup %2751  ;;  %v1889_v63 = vmul.f32 1.442695, %v1777_v57  ;;  %v1891_v1 = vmul.f32 1.442695, %v1778_v19  ;;  %v2803_v19 = vld [vmem:[#allocation2 + $0x8] sm:$0xff] }
 0x690   :  { %v2754_v37 = vpop.eup %2753  ;;  %v1710_v45 = vpop.xlane.xlu0 %1709  ;;  %v2440_v10 = vpack.c.bf16 %v2752_v6, %v2748_v5  ;;  %v3806_v5 = vld [vmem:[#allocation13_spill] sm:$0xff] }
 0x691   :  { %v1779_v51 = vsub.f32 %v3537_v44, %v1710_v45  ;;  %v1780_v34 = vsub.f32 %v3795_v54, %v1710_v45  ;;  %v2438_v35 = vpack.c.bf16 %v2754_v37, %v2750_v53  ;;  %2763 = vpow2.f32 %v1889_v63  ;;  %v3797_v44 = vld [vmem:[#allocation19_spill] sm:$0xff]  ;;  %v3807_v53 = vld [vmem:[#allocation14_spill] sm:$0xff] }
 0x692   :  { %2765 = vpow2.f32 %v1891_v1  ;;  %v1106_v57 = vadd.f32 %v2802_v21, %v3806_v5  ;;  %v1107_v6 = vadd.f32 %v2803_v19, %v3807_v53  ;;  %v2806_v5 = vld [vmem:[%s3698_s3] sm:$0xff] }
 0x693   :  { %v1893_v25 = vmul.f32 1.442695, %v1779_v51  ;;  %v1895_v26 = vmul.f32 1.442695, %v1780_v34  ;;  %2439 = vmatprep.subr.bf16.mxu0 %v2438_v35  ;;  %2503 = vmatprep.subr.bf16.mxu1 %v2438_v35  ;;  %v2756_v38 = vpop.eup %2755  ;;  %v2808_v53 = vld [vmem:[#allocation2 + $0x20] sm:$0xff] }
 0x694   :  { %2441 = vmatpush1.bf16.xpose.msra.mxu0 %v2440_v10  ;;  %2505 = vmatpush1.bf16.xpose.msra.mxu1 %v2440_v10  ;;  %v1713_v9 = vpop.xlane.xlu1 %1712  ;;  %v2758_v60 = vpop.eup %2757 }
 0x695   :  { %2767 = vpow2.f32 %v1893_v25  ;;  %v1781_v0 = vsub.f32 %v3796_v42, %v1713_v9  ;;  %v1782_v2 = vsub.f32 %v3797_v44, %v1713_v9  ;;  %v3808_v25 = vld [vmem:[#allocation26_spill] sm:$0xff]  ;;  %v3809_v9 = vld [vmem:[#allocation27_spill] sm:$0xff] }
 0x696   :  { %2769 = vpow2.f32 %v1895_v26 }
 0x697   :  { %v2760_v16 = vpop.eup %2759  ;;  %v1897_v61 = vmul.f32 1.442695, %v1781_v0  ;;  %v1899_v20 = vmul.f32 1.442695, %v1782_v2 }
 0x698   :  { %v2762_v50 = vpop.eup %2761  ;;  %v1716_v13 = vpop.xlane.xlu0 %1715  ;;  %v2444_v43 = vpack.c.bf16 %v2760_v16, %v2756_v38 }
 0x699   :  { %v1783_v14 = vsub.f32 %v3798_v58, %v1716_v13  ;;  %v1784_v22 = vsub.f32 %v3799_v15, %v1716_v13  ;;  %v2442_v7 = vpack.c.bf16 %v2762_v50, %v2758_v60  ;;  %2771 = vpow2.f32 %v1897_v61  ;;  %v2804_v50 = vld [vmem:[#allocation2 + $0x10] sm:$0xff]  ;;  %v3810_v61 = vld [vmem:[#allocation15_spill] sm:$0xff]  ;;  %v3811_v58 = vld [vmem:[#allocation16_spill] sm:$0xff] }
 0x69a   :  { %v1108_v13 = vadd.f32 %v2804_v50, %v3810_v61 }
 0x69b   :  { %v1901_v55 = vmul.f32 1.442695, %v1783_v14  ;;  %v1903_v56 = vmul.f32 1.442695, %v1784_v22  ;;  %2443 = vmatprep.subr.bf16.mxu0 %v2442_v7  ;;  %2507 = vmatprep.subr.bf16.mxu1 %v2442_v7  ;;  %v2764_v18 = vpop.eup %2763 }
 0x69c   :  { %2445 = vmatpush1.bf16.xpose.msra.mxu0 %v2444_v43  ;;  %2509 = vmatpush1.bf16.xpose.msra.mxu1 %v2444_v43  ;;  %v1719_v40 = vpop.xlane.xlu1 %1718  ;;  %v2766_v49 = vpop.eup %2765  ;;  %v2805_v43 = vld [vmem:[#allocation2 + $0x18] sm:$0xff] }
 0x69d   :  { %2773 = vpow2.f32 %v1901_v55  ;;  %v1785_v4 = vsub.f32 %v3800_v23, %v1719_v40  ;;  %v1786_v39 = vsub.f32 %v3801_v62, %v1719_v40  ;;  %v1109_v14 = vadd.f32 %v2805_v43, %v3811_v58 }
 0x69e   :  { %2775 = vpow2.f32 %v1903_v56 }
 0x69f   :  { %v2768_v30 = vpop.eup %2767  ;;  %2777 = vpow2.f32 %v1899_v20  ;;  %v1905_v8 = vmul.f32 1.442695, %v1785_v4  ;;  %v1907_v28 = vmul.f32 1.442695, %v1786_v39 }
 0x6a0   :  { %v2770_v3 = vpop.eup %2769  ;;  %v1722_v48 = vpop.xlane.xlu0 %1721  ;;  %v2448_v11 = vpack.c.bf16 %v2768_v30, %v2764_v18  ;;  %v3813_v30 = vld [vmem:[#allocation11_spill] sm:$0xff] }
 0x6a1   :  { %v1787_v12 = vsub.f32 %v3802_v36, %v1722_v48  ;;  %v1788_v29 = vsub.f32 %v3803_v24, %v1722_v48  ;;  %v2446_v47 = vpack.c.bf16 %v2770_v3, %v2766_v49  ;;  %2779 = vpow2.f32 %v1905_v8  ;;  %v3812_v49 = vld [vmem:[#allocation10_spill] sm:$0xff] }
 0x6a2   :  { %2781 = vpow2.f32 %v1907_v28  ;;  %v1212_v8 = vadd.f32 %v3813_v30, %v3812_v49  ;;  %v3814_v3 = vmov 1.0   ;;  %v3815_v28 = vmov 0.0  }
 0x6a3   :  { %v1909_v33 = vmul.f32 1.442695, %v1787_v12  ;;  %v1911_v46 = vmul.f32 1.442695, %v1788_v29  ;;  %2447 = vmatprep.subr.bf16.mxu0 %v2446_v47  ;;  %2511 = vmatprep.subr.bf16.mxu1 %v2446_v47  ;;  %v2772_v52 = vpop.eup %2771 }
 0x6a4   :  { %2449 = vmatpush1.bf16.xpose.msra.mxu0 %v2448_v11  ;;  %2513 = vmatpush1.bf16.xpose.msra.mxu1 %v2448_v11  ;;  %v1725_v31 = vpop.xlane.xlu1 %1724 }
 0x6a5   :  { %2783 = vpow2.f32 %v1909_v33  ;;  %v1789_v27 = vsub.f32 %v3804_v32, %v1725_v31  ;;  %v1790_v59 = vsub.f32 %v3805_v41, %v1725_v31  ;;  %v3816_v41 = vld [vmem:[#allocation12_spill] sm:$0xff] }
 0x6a6   :  { %2785 = vpow2.f32 %v1911_v46 }
 0x6a7   :  { %v2774_v17 = vpop.eup %2773  ;;  %v1913_v63 = vmul.f32 1.442695, %v1789_v27  ;;  %v1915_v1 = vmul.f32 1.442695, %v1790_v59 }
 0x6a8   :  { %v2776_v37 = vpop.eup %2775  ;;  %v3649_v45 = vpop.permute.xlu1 %1112  ;;  %v2452_v51 = vpack.c.bf16 %v2774_v17, %v2772_v52 }
 0x6a9   :  { %v1728_v10 = vpop.xlane.xlu0 %1727  ;;  %v2778_v54 = vpop.eup %2777  ;;  %v1120_v34 = vadd.f32 %v3649_v45, %v1106_v57  ;;  %v1121_v35 = vadd.f32 %v3649_v45, %v1107_v6  ;;  %2787 = vpow2.f32 %v1913_v63  ;;  %v2807_v57 = vld [vmem:[%s3698_s3 + $0x8] sm:$0xff]  ;;  %s2834_s3 = scalar_lea.vmem %s2177_s10, 1024 }
 0x6aa   :  { %v1791_v26 = vsub.f32 %v3808_v25, %v1728_v10  ;;  %v1792_v38 = vsub.f32 %v3809_v9, %v1728_v10  ;;  %v2450_v42 = vpack.c.bf16 %v2776_v37, %v2778_v54  ;;  %2789 = vpow2.f32 %v1915_v1  ;;  %v2809_v37 = vld [vmem:[#allocation2 + $0x28] sm:$0xff]  ;;  %p2835_p8 = scmp.ne.s32.totalorder %s2177_s10, %s2834_s3  ;;  %p2840_p10 = scmp.lt.s32.totalorder %s2834_s3, %s2834_s3 }
 0x6ab   :  { %1124 = vst [vmem:[#allocation5] sm:$0xff] %v1120_v34  ;;  %1125 = vst [vmem:[#allocation5 + $0x8] sm:$0xff] %v1121_v35  ;;  %v2780_v16 = vpop.eup %2779  ;;  %v2810_v34 = vld [vmem:[#allocation2 + $0x30] sm:$0xff] }
 0x6ac   :  { %v1917_v0 = vmul.f32 1.442695, %v1791_v26  ;;  %v1919_v60 = vmul.f32 1.442695, %v1792_v38  ;;  %2451 = vmatprep.subr.bf16.mxu0 %v2450_v42  ;;  %2515 = vmatprep.subr.bf16.mxu1 %v2450_v42  ;;  %v2782_v44 = vpop.eup %2781  ;;  %v2811_v26 = vld [vmem:[#allocation2 + $0x38] sm:$0xff]  ;;  %p2841_p11 = por %p2840_p10, %p2839_p9 }
 0x6ad   :  { %2453 = vmatpush1.bf16.xpose.msra.mxu0 %v2452_v51  ;;  %2517 = vmatpush1.bf16.xpose.msra.mxu1 %v2452_v51 }
 0x6ae   :  { %2791 = vpow2.f32 %v1917_v0  ;;  %p2842_p12 = pnand %p2841_p11, %p2835_p8 }
 0x6af   :  { %2793 = vpow2.f32 %v1919_v60  ;;  %v2784_v2 = vpop.eup %2783 }
 0x6b0   :  { %v2786_v15 = vpop.eup %2785  ;;  %v3657_v22 = vpop.permute.xlu0 %1117  ;;  %v2456_v7 = vpack.c.bf16 %v2784_v2, %v2780_v16 }
 0x6b1   :  { %v1122_v20 = vadd.f32 %v3657_v22, %v1108_v13  ;;  %v1123_v55 = vadd.f32 %v3657_v22, %v1109_v14  ;;  %v2454_v56 = vpack.c.bf16 %v2786_v15, %v2782_v44 }
 0x6b3   :  { %1126 = vst [vmem:[#allocation5 + $0x10] sm:$0xff] %v1122_v20  ;;  %1127 = vst [vmem:[#allocation5 + $0x18] sm:$0xff] %v1123_v55  ;;  %2455 = vmatprep.subr.bf16.mxu0 %v2454_v56  ;;  %2519 = vmatprep.subr.bf16.mxu1 %v2454_v56  ;;  %v2788_v40 = vpop.eup %2787 }
 0x6b4   :  { %v2790_v18 = vpop.eup %2789 }
 0x6b5   :  { %2457 = vmatpush1.bf16.xpose.msra.mxu0 %v2456_v7  ;;  %2521 = vmatpush1.bf16.xpose.msra.mxu1 %v2456_v7 }
 0x6b8   :  { %v2792_v23 = vpop.eup %2791 }
 0x6b9   :  { %v2794_v4 = vpop.eup %2793  ;;  %v2460_v62 = vpack.c.bf16 %v2792_v23, %v2788_v40 }
 0x6ba   :  { %v2458_v39 = vpack.c.bf16 %v2794_v4, %v2790_v18 }
 0x6bc   :  { %2459 = vmatprep.subr.bf16.mxu0 %v2458_v39  ;;  %2523 = vmatprep.subr.bf16.mxu1 %v2458_v39 }
 0x6bd   :  { %2461 = vmatpush1.bf16.xpose.msra.mxu0 %v2460_v62  ;;  %2525 = vmatpush1.bf16.xpose.msra.mxu1 %v2460_v62 }
 0x6c4   :  { %1986 = vmatmul.mubr.f32.vlgmr.msra.gmra.mrb[14].mxu0 %v1212_v8  ;;  %2057 = vmatmul.mubr.f32.vlgmr.msra.gmra.mrb[134].mxu1 %v3814_v3 }
 0x6c5   :  { %2145 = vmatprep.mubr.f32.mxu0 %v3815_v28 }
 0x797   :  { %v1987_v48 = vpop.f32.mrb[14].mxu0  ;;  %v2058_v11 = vpop.f32.mrb[134].mxu1 }
 0x798   :  { %2795 = vrcp.f32 %v2058_v11  ;;  %v1989_v36 = vpop.f32.mrb[15].mxu0  ;;  %v2060_v12 = vpop.f32.mrb[135].mxu1 }
 0x799   :  { %2797 = vrcp.f32 %v2060_v12 }
 0x7a2   :  { %v2796_v24 = vpop.eup %2795 }
 0x7a3   :  { %v2798_v29 = vpop.eup %2797  ;;  %v2065_v47 = vmul.f32 %v2796_v24, %v2058_v11 }
 0x7a4   :  { %v2066_v33 = vmul.f32 %v2798_v29, %v2060_v12 }
 0x7a5   :  { %v2067_v46 = vsub.f32 2.0, %v2065_v47 }
 0x7a6   :  { %v2068_v31 = vsub.f32 2.0, %v2066_v33 }
 0x7a7   :  { %v2069_v32 = vmul.f32 %v2796_v24, %v2067_v46 }
 0x7a8   :  { %v2070_v27 = vmul.f32 %v2798_v29, %v2068_v31 }
 0x7a9   :  { %v2074_v59 = vrot.slane %v2069_v32, %v3816_v41 }
 0x7aa   :  { %v2078_v52 = vrot.slane %v2070_v27, %v3816_v41 }
 0x7ab   :  { %v2079_v17 = vmul.f32 %v2074_v59, %v1987_v48 }
 0x7ac   :  { %v2080_v21 = vmul.f32 %v2078_v52, %v1989_v36 }
 0x7ae   :  { %2081 = vmatprep.subr.mxu0 %v2080_v21 }
 0x7af   :  { %2082 = vmatpush1.msra.mxu0 %v2079_v17 }
 0x7b0   :  { %2260 = vmatmul.mubr.msk.f32.vlgmr.msra.gmra.mrb[16].mxu0 %vm221_vm1, %v2806_v5 }
 0x7b1   :  { %2151 = vmatprep.mubr.f32.mxu0 %v3815_v28 }
 0x7b4   :  { %2261 = vmatmul.mubr.msk.f32.gmra.mrb[18].mxu0 %vm221_vm1, %v2807_v57 }
 0x883   :  { %v2147_v19 = vpop.f32.mrb[16].mxu0 }
 0x884   :  { %v2158_v6 = vadd.f32 %v2808_v53, %v2147_v19  ;;  %v2149_v63 = vpop.f32.mrb[17].mxu0 }
 0x885   :  { %v2159_v1 = vadd.f32 %v2809_v37, %v2149_v63 }
 0x886   :  { %v2162_v10 = vadd.f32 %v2158_v6, %v3649_v45 }
 0x887   :  { %v2163_v51 = vadd.f32 %v2159_v1, %v3649_v45  ;;  %v2153_v54 = vpop.f32.mrb[18].mxu0 }
 0x888   :  { %2167 = vst [vmem:[#allocation5 + $0x20] sm:$0xff] %v2162_v10  ;;  %v2160_v35 = vadd.f32 %v2810_v34, %v2153_v54  ;;  %v2155_v25 = vpop.f32.mrb[19].mxu0 }
 0x889   :  { %2168 = vst [vmem:[#allocation5 + $0x28] sm:$0xff] %v2163_v51  ;;  %v2161_v9 = vadd.f32 %v2811_v26, %v2155_v25 }
 0x88a   :  { %v2164_v38 = vadd.f32 %v2160_v35, %v3657_v22 }
 0x88b   :  { %v2165_v42 = vadd.f32 %v2161_v9, %v3657_v22 }
 0x88c   :  { %2169 = vst [vmem:[#allocation5 + $0x30] sm:$0xff] %v2164_v38 }
 0x88d   :  { %2170 = vst [vmem:[#allocation5 + $0x38] sm:$0xff] %v2165_v42 }
 0x88e   :  { %2845 = shalt.err (!%p2842_p12)
}
 0x88f   :  { %s2846_s13 = scalar_lea.hbm %s3700_s5, 1024 }
 0x890   :  { %p2847_p13 = scmp.ne.s32.totalorder %s3700_s5, %s2846_s13  ;;  %p2850_p0 = scmp.lt.u32.totalorder %s2846_s13, %s3700_s5 }
 0x892   :  { %p2852_p1 = pnand %p2850_p0, %p2847_p13 }
 0x894   :  { %2855 = shalt.err (!%p2852_p1)
}
 0x895   :  { %2182 = dma.vmem_to_hbm [thread:$0]  %s2177_s10, 1024, %s3700_s5, [#allocation4], %s2861_s28, %s2861_s28, %s2862_s29  }
 0x896   :  { %2858 = dma.done.wait [#allocation4], 1024  }
 0x897   :  { %2859 = vsyncadd [#allocation4], 4294966272 }
 0x898   :  { %2186 = vsyncpa [#allocation3], 1 }
 0x899   :  { %2187 = vsyncpa [#allocation4], 1 }

</bundles_post_ra>
